<compile_context>
chip_gen: v7x
topology: tpu7x:2x2x1
jax: 0.10.0
libtpu: 0.0.40
codegen_flags: <defaults>
</compile_context>

<pallas_src>
import functools

import numpy as np

import jax
import jax.numpy as jnp
from jax.experimental import pallas as pl
from jax.experimental.pallas import tpu as pltpu


# ======================================================================================
# Helpers: per-generation VMEM budget and a one-time pltpu.roll capability probe
# ======================================================================================
def _vmem_limit_bytes(estimate_bytes):
    """VMEM budget: generous but leaves ~25% headroom for compiler scratch/semaphores.
    -> ~48 MiB on v7x (64 MiB physical), ~96 MiB on v5e/v6e (128 MiB physical)."""
    cap = None
    try:
        cap = int(pltpu.get_tpu_info().vmem_capacity_bytes)
    except Exception:
        cap = None
    if not cap:
        cap = 64 << 20          # conservative fallback: v7x physical VMEM per TensorCore
    cap = (cap * 3) // 4
    return int(min(cap, max(2 * estimate_bytes, 32 << 20)))


@functools.lru_cache(maxsize=None)
def _skew_roll_mode(length):
    """Probe pltpu.roll at this lane width (runs eagerly once, results cached).
    Returns 'hi'  if pltpu.roll follows np.roll (positive shift -> higher indices),
            'lo'  if it rotates the other way,
            None  if unsupported at this shape -> fall back to slice-concat."""
    if length < 2:
        return None
    try:
        def _probe(x_ref, o_ref):
            o_ref[...] = pltpu.roll(x_ref[...], 1, axis=1)

        x = np.tile(np.arange(length, dtype=np.float32)[None, :], (8, 1))
        out = np.asarray(
            pl.pallas_call(
                _probe,
                out_shape=jax.ShapeDtypeStruct((8, length), jnp.float32),
            )(jnp.asarray(x)))
        if np.array_equal(out, np.roll(x, 1, axis=1)):
            return "hi"
        if np.array_equal(out, np.roll(x, -1, axis=1)):
            return "lo"
        return None
    except Exception:
        return None


def _default_q_tile(L, N):
    # A fat M dim keeps the 256-wide MXU (v6e/v7x) fed; keep >= 2 q-tiles when N == 1
    # so both v7x TensorCores get work through the "parallel" grid axes.
    for cand in (512, 256, 128):
        if L % cand == 0 and (N > 1 or L // cand >= 2):
            return cand
    return L


# ======================================================================================
# Kernel 1: fused multi-head self-attention (spatiotemporal, rel_emb=True)
# ======================================================================================
def _mhsa_kernel(x_ref, wq_ref, bq_ref, wk_ref, bk_ref, wv_ref, bv_ref,
                 e_ref, wo_ref, bo_ref, o_ref, z_ref,
                 *, q_tile, roll_mode, approx_recip):
    TQ = q_tile
    L, E = x_ref.shape
    D = e_ref.shape[1]
    H = E // D
    cd = x_ref.dtype                                    # compute dtype (pre-cast in wrapper)

    q_start = pl.multiple_of(pl.program_id(1) * TQ, TQ)
    x_all = x_ref[...]                                  # (L, E)  key/value rows (q==k==v)
    x_q = x_ref[pl.ds(q_start, TQ), :]                  # (TQ, E) query rows of this tile

    # Fused per-head projections: lane-dense (rows, E) @ (E, E) MXU matmuls with
    # block-diagonal weights; f32 accumulation, single cast back to compute dtype.
    qp = (jnp.dot(x_q, wq_ref[...], preferred_element_type=jnp.float32) + bq_ref[...]).astype(cd)
    kp = (jnp.dot(x_all, wk_ref[...], preferred_element_type=jnp.float32) + bk_ref[...]).astype(cd)
    vp = (jnp.dot(x_all, wv_ref[...], preferred_element_type=jnp.float32) + bv_ref[...]).astype(cd)

    # Head-invariant masks / skew selects, hoisted out of the head loop.
    row = q_start + jax.lax.broadcasted_iota(jnp.int32, (TQ, L), 0)     # global query index
    col = jax.lax.broadcasted_iota(jnp.int32, (TQ, L), 1)               # key / rel index
    keep = col > row                    # reference keeps only the strictly-upper triangle
    rel_keep = col <= row               # validity region of the skewed relative term
    shift = (L - 1) - (q_start + jax.lax.broadcasted_iota(jnp.int32, (TQ, 1), 0))
    skew_steps = []                     # binary decomposition of the per-row left rotation
    amt = 1
    while amt < L:
        skew_steps.append((amt, (shift & amt) != 0))
        amt *= 2
    neg_big = jnp.float32(-1e20)
    e_all = e_ref[...]                  # (L, D), shared by every head

    for h in range(H):                  # heads fused inside one grid step
        sl = slice(h * D, (h + 1) * D)
        qh = qp[:, sl]                  # (TQ, D)
        kh = kp[:, sl]                  # (L, D)   (already carries 1/sqrt(E))
        vh = vp[:, sl]                  # (L, D)

        # Attention scores on the MXU (scale folded into K in the wrapper).
        qk = jax.lax.dot_general(qh, kh, (((1,), (1,)), ((), ())),
                                 preferred_element_type=jnp.float32)    # (TQ, L)
        logits = jnp.where(keep, qk, neg_big)
        m = jnp.max(logits, axis=-1, keepdims=True)
        p_un = jnp.exp(logits - m)
        denom = jnp.sum(p_un, axis=-1, keepdims=True)
        probs = p_un * pl.reciprocal(denom, approx=approx_recip)        # softmax

        # Relative term: QE on the MXU, then the Music-Transformer skew
        # S[q, k] = (k <= q) * QE[q, k + L - 1 - q] via log2(L) conditional lane
        # rotations (XLU) with head-invariant select masks.
        qe = jax.lax.dot_general(qh, e_all, (((1,), (1,)), ((), ())),
                                 preferred_element_type=jnp.float32)    # (TQ, L)
        skewed = qe
        for amt, take in skew_steps:
            if roll_mode == "hi":       # pltpu.roll == np.roll -> left-rotate by amt
                rolled = pltpu.roll(skewed, L - amt, axis=1)
            elif roll_mode == "lo":     # opposite rotation convention
                rolled = pltpu.roll(skewed, amt, axis=1)
            else:                       # fallback: lane-slice concat (always supported)
                rolled = jnp.concatenate([skewed[:, amt:], skewed[:, :amt]], axis=1)
            skewed = jnp.where(take, rolled, skewed)
        s = jnp.where(rel_keep, skewed, 0.0)

        attn = (probs + s).astype(cd)                   # reference adds S after softmax
        # Direct store into a lane-dense VMEM scratch (no H-way lane concat).
        z_ref[:, sl] = jnp.dot(attn, vh, preferred_element_type=jnp.float32)

    # Single lane-dense fc_out matmul over the concatenated heads.
    out = jnp.dot(z_ref[...].astype(cd), wo_ref[...],
                  preferred_element_type=jnp.float32) + bo_ref[...]
    o_ref[...] = out.astype(o_ref.dtype)


def self_attention_forward(p, x, *, heads, compute_dtype=jnp.bfloat16, q_tile=None):
    N, L, E = x.shape
    H = heads
    D = E // H
    assert D * H == E
    TQ = q_tile or _default_q_tile(L, N)
    assert L % TQ == 0 and (TQ % 8 == 0 or TQ == L)
    cd = jnp.dtype(compute_dtype)
    out_dtype = jnp.float32 if cd == jnp.dtype(jnp.float32) else compute_dtype

    # Block-diagonal projection weights: applying Linear(D, D) per head chunk of the
    # embed dim == one (rows, E) @ (E, E) matmul with kron(I_H, W^T).
    # The 1/sqrt(E) softmax scale is folded into Wk/bk (NOT Wq: Q also feeds QE).
    scale = 1.0 / (E ** 0.5)
    eye_h = jnp.eye(H, dtype=jnp.float32)
    wq_bd = jnp.kron(eye_h, p["Wq"].T).astype(cd)
    wk_bd = (jnp.kron(eye_h, p["Wk"].T) * scale).astype(cd)
    wv_bd = jnp.kron(eye_h, p["Wv"].T).astype(cd)
    bq = jnp.tile(p["bq"], H).reshape(1, E).astype(jnp.float32)
    bk = (jnp.tile(p["bk"], H) * scale).reshape(1, E).astype(jnp.float32)
    bv = jnp.tile(p["bv"], H).reshape(1, E).astype(jnp.float32)
    e0 = p["E"][0].astype(cd)           # (L, D) relative embedding (shared by heads)
    wo_t = p["Wo"].T.astype(cd)         # (E, E)
    bo = p["bo"].reshape(1, E).astype(jnp.float32)
    x_c = x.astype(cd)                  # single pre-cast copy of x (q == k == v)

    roll_mode = _skew_roll_mode(L)      # cached, eager probe

    kernel = functools.partial(
        _mhsa_kernel,
        q_tile=TQ,
        roll_mode=roll_mode,
        approx_recip=(cd != jnp.dtype(jnp.float32)))

    grid = (N, L // TQ)

    ci = cd.itemsize
    co = jnp.dtype(out_dtype).itemsize
    steps = N * (L // TQ)
    flops = steps * (2 * E * E * (2 * TQ + 2 * L) + 6 * TQ * L * E)
    cost = pl.CostEstimate(
        flops=int(flops),
        transcendentals=int(N * H * L * L),
        bytes_accessed=int(steps * L * E * ci + (4 * E * E + L * D) * ci
                           + 4 * E * 4 + N * L * E * co))

    est = (2 * L * E * ci                       # x block (double buffered)
           + 2 * (4 * E * E + L * D) * ci       # weights + relative embedding
           + 8 * E * 4                          # biases
           + 2 * TQ * E * co                    # output block
           + TQ * E * 4                         # z scratch
           + 10 * TQ * L * 4)                   # live per-head f32 temporaries

    grid_spec = pltpu.PrefetchScalarGridSpec(
        num_scalar_prefetch=0,
        grid=grid,
        in_specs=[
            pl.BlockSpec((None, L, E), lambda n, t: (n, 0, 0)),   # x (q == k == v), one DMA
            pl.BlockSpec((E, E), lambda n, t: (0, 0)),            # Wq (block-diag)
            pl.BlockSpec((1, E), lambda n, t: (0, 0)),            # bq
            pl.BlockSpec((E, E), lambda n, t: (0, 0)),            # Wk * 1/sqrt(E)
            pl.BlockSpec((1, E), lambda n, t: (0, 0)),            # bk * 1/sqrt(E)
            pl.BlockSpec((E, E), lambda n, t: (0, 0)),            # Wv
            pl.BlockSpec((1, E), lambda n, t: (0, 0)),            # bv
            pl.BlockSpec((L, D), lambda n, t: (0, 0)),            # E (relative emb)
            pl.BlockSpec((E, E), lambda n, t: (0, 0)),            # Wo^T
            pl.BlockSpec((1, E), lambda n, t: (0, 0)),            # bo
        ],
        out_specs=pl.BlockSpec((None, TQ, E), lambda n, t: (n, t, 0)),
        scratch_shapes=[pltpu.VMEM((TQ, E), jnp.float32)],        # lane-dense head results
    )

    return pl.pallas_call(
        kernel,
        out_shape=jax.ShapeDtypeStruct((N, L, E), out_dtype),
        grid_spec=grid_spec,
        compiler_params=pltpu.CompilerParams(
            dimension_semantics=("parallel", "parallel"),
            vmem_limit_bytes=_vmem_limit_bytes(est)),
        cost_estimate=cost,
    )(x_c, wq_bd, bq, wk_bd, bk, wv_bd, bv, e0, wo_t, bo)


# ======================================================================================
# Kernel 2: encoder-block tail — residual + BatchNorm1d + FFN + residual + BatchNorm1d
# (+ the module-level fc_out fused in for the last layer)
# BatchNorm1d(seq_len): channel = seq position, stats over batch x embed, so a block
# holding the full batch and embed dims is self-contained per seq-row tile.
# ======================================================================================
def _tail_body(x_ref, a_ref, g1_ref, be1_ref, g2_ref, be2_ref,
               w1_ref, b1_ref, w2_ref, b2_ref, wf_ref, bf_ref, o_ref,
               *, eps, neg_slope):
    N, TL, E = x_ref.shape
    cnt = jnp.float32(N * E)
    cd = w1_ref.dtype

    # residual 1 + BatchNorm1d (batch statistics, biased variance)
    y = x_ref[...].astype(jnp.float32) + a_ref[...].astype(jnp.float32)   # (N, TL, E)
    mean1 = jnp.sum(jnp.sum(y, axis=2, keepdims=True), axis=0, keepdims=True) / cnt
    d1 = y - mean1
    v1 = jnp.sum(jnp.sum(d1 * d1, axis=2, keepdims=True), axis=0, keepdims=True) / cnt
    h = d1 * jax.lax.rsqrt(v1 + eps) * g1_ref[...] + be1_ref[...]

    # position-wise feed-forward: flattened to one (N*TL, E) MXU matmul pair
    # (layout-preserving reshape: TL is a multiple of 8 or the full length).
    h2 = h.reshape(N * TL, E)
    t = jnp.dot(h2.astype(cd), w1_ref[...], preferred_element_type=jnp.float32) + b1_ref[...]
    t = jnp.where(t >= 0, t, neg_slope * t)                               # LeakyReLU(0.01)
    f = jnp.dot(t.astype(cd), w2_ref[...], preferred_element_type=jnp.float32) + b2_ref[...]
    y2 = (f + h2).reshape(N, TL, E)                                       # residual 2

    mean2 = jnp.sum(jnp.sum(y2, axis=2, keepdims=True), axis=0, keepdims=True) / cnt
    d2 = y2 - mean2
    v2 = jnp.sum(jnp.sum(d2 * d2, axis=2, keepdims=True), axis=0, keepdims=True) / cnt
    out = d2 * jax.lax.rsqrt(v2 + eps) * g2_ref[...] + be2_ref[...]

    if wf_ref is not None:                                                # fused module fc_out
        out = (jnp.dot(out.reshape(N * TL, E).astype(cd), wf_ref[...],
                       preferred_element_type=jnp.float32)
               + bf_ref[...]).reshape(N, TL, E)
    o_ref[...] = out.astype(o_ref.dtype)


def _encoder_tail_kernel(x_ref, a_ref, g1_ref, be1_ref, g2_ref, be2_ref,
                         w1_ref, b1_ref, w2_ref, b2_ref, o_ref, *, eps, neg_slope):
    _tail_body(x_ref, a_ref, g1_ref, be1_ref, g2_ref, be2_ref,
               w1_ref, b1_ref, w2_ref, b2_ref, None, None, o_ref,
               eps=eps, neg_slope=neg_slope)


def _encoder_tail_final_kernel(x_ref, a_ref, g1_ref, be1_ref, g2_ref, be2_ref,
                               w1_ref, b1_ref, w2_ref, b2_ref, wf_ref, bf_ref, o_ref,
                               *, eps, neg_slope):
    _tail_body(x_ref, a_ref, g1_ref, be1_ref, g2_ref, be2_ref,
               w1_ref, b1_ref, w2_ref, b2_ref, wf_ref, bf_ref, o_ref,
               eps=eps, neg_slope=neg_slope)


def encoder_block_tail_forward(layer, x, attn_out, *, forward_expansion,
                               compute_dtype=jnp.bfloat16,
                               final_w=None, final_b=None, l_tile=None):
    N, L, E = x.shape
    F = forward_expansion * E
    cd = jnp.dtype(compute_dtype)
    TL = l_tile or next((c for c in (512, 256, 128) if L % c == 0), L)
    assert L % TL == 0

    g1 = layer["gamma1"].reshape(1, L, 1)
    be1 = layer["beta1"].reshape(1, L, 1)
    g2 = layer["gamma2"].reshape(1, L, 1)
    be2 = layer["beta2"].reshape(1, L, 1)
    w1t = layer["W1"].T.astype(cd)      # (E, F), pre-cast
    b1 = layer["b1"].reshape(1, F)
    w2t = layer["W2"].T.astype(cd)      # (F, E), pre-cast
    b2 = layer["b2"].reshape(1, E)

    in_arrays = [x, attn_out, g1, be1, g2, be2, w1t, b1, w2t, b2]
    in_specs = [
        pl.BlockSpec((N, TL, E), lambda t: (0, t, 0)),    # x (residual)
        pl.BlockSpec((N, TL, E), lambda t: (0, t, 0)),    # attention output
        pl.BlockSpec((1, TL, 1), lambda t: (0, t, 0)),    # gamma1
        pl.BlockSpec((1, TL, 1), lambda t: (0, t, 0)),    # beta1
        pl.BlockSpec((1, TL, 1), lambda t: (0, t, 0)),    # gamma2
        pl.BlockSpec((1, TL, 1), lambda t: (0, t, 0)),    # beta2
        pl.BlockSpec((E, F), lambda t: (0, 0)),           # W1^T
        pl.BlockSpec((1, F), lambda t: (0, 0)),           # b1
        pl.BlockSpec((F, E), lambda t: (0, 0)),           # W2^T
        pl.BlockSpec((1, E), lambda t: (0, 0)),           # b2
    ]
    if final_w is not None:                               # last layer: fuse module fc_out
        in_arrays += [final_w.T.astype(cd), final_b.reshape(1, E)]
        in_specs += [pl.BlockSpec((E, E), lambda t: (0, 0)),
                     pl.BlockSpec((1, E), lambda t: (0, 0))]
        kern = _encoder_tail_final_kernel
    else:
        kern = _encoder_tail_kernel

    kernel = functools.partial(kern, eps=1e-5, neg_slope=0.01)

    ai = jnp.dtype(attn_out.dtype).itemsize
    ci = cd.itemsize
    est = (2 * N * TL * E * 4 + 2 * N * TL * E * ai     # x + attn blocks (double buffered)
           + 2 * 2 * E * F * ci + 2 * E * E * ci        # weights
           + 2 * N * TL * E * 4                         # output block
           + 2 * N * TL * F * 4)                        # FFN intermediate
    flops = 4 * N * L * E * F + (2 * N * L * E * E if final_w is not None else 0)
    cost = pl.CostEstimate(flops=int(flops), transcendentals=0,
                           bytes_accessed=int(N * L * E * (8 + ai) + 2 * E * F * ci))

    return pl.pallas_call(
        kernel,
        out_shape=jax.ShapeDtypeStruct((N, L, E), jnp.float32),
        grid_spec=pltpu.PrefetchScalarGridSpec(
            num_scalar_prefetch=0,
            grid=(L // TL,),
            in_specs=in_specs,
            out_specs=pl.BlockSpec((N, TL, E), lambda t: (0, t, 0))),
        compiler_params=pltpu.CompilerParams(
            dimension_semantics=("parallel",),
            vmem_limit_bytes=_vmem_limit_bytes(est)),
        cost_estimate=cost,
    )(*in_arrays)


# ======================================================================================
# Full EncoderModule forward (Pallas path)
# ======================================================================================
def encoder_module_forward(params, x, *, heads, forward_expansion,
                           compute_dtype=jnp.bfloat16, q_tile=None):
    layers = params["layers"]
    assert layers, "EncoderModule needs at least one layer"
    out = None
    # NOTE: the original PyTorch EncoderModule does `out = layer(x)` for EVERY layer,
    # i.e. every layer re-reads the original x. Reproduced faithfully here; the module
    # fc_out is fused into the last layer's tail kernel.
    for li, layer in enumerate(layers):
        is_last = li == len(layers) - 1
        a = self_attention_forward(layer["attn"], x, heads=heads,
                                   compute_dtype=compute_dtype, q_tile=q_tile)
        out = encoder_block_tail_forward(
            layer, x, a,
            forward_expansion=forward_expansion,
            compute_dtype=compute_dtype,
            final_w=params["Wf"] if is_last else None,
            final_b=params["bf"] if is_last else None)
    return out


# ======================================================================================
# Deterministic parameter init (mirrors PyTorch defaults)
# ======================================================================================
def _linear_params(key, out_f, in_f):
    kw, kb = jax.random.split(key)
    bound = 1.0 / (in_f ** 0.5)
    W = jax.random.uniform(kw, (out_f, in_f), jnp.float32, -bound, bound)
    b = jax.random.uniform(kb, (out_f,), jnp.float32, -bound, bound)
    return W, b


def init_params(key, *, embed_size, heads, seq_len, forward_expansion, num_layers):
    D = embed_size // heads
    F = forward_expansion * embed_size
    keys = jax.random.split(key, num_layers + 1)
    layers = []
    for i in range(num_layers):
        ks = jax.random.split(keys[i], 7)
        Wq, bq = _linear_params(ks[0], D, D)
        Wk, bk = _linear_params(ks[1], D, D)
        Wv, bv = _linear_params(ks[2], D, D)
        Wo, bo = _linear_params(ks[3], embed_size, embed_size)
        E = jax.random.normal(ks[4], (1, seq_len, D), jnp.float32)
        W1, b1 = _linear_params(ks[5], F, embed_size)
        W2, b2 = _linear_params(ks[6], embed_size, F)
        layers.append({
            "attn": {"Wq": Wq, "bq": bq, "Wk": Wk, "bk": bk, "Wv": Wv, "bv": bv,
                     "E": E, "Wo": Wo, "bo": bo},
            "gamma1": jnp.ones((seq_len,), jnp.float32),
            "beta1": jnp.zeros((seq_len,), jnp.float32),
            "gamma2": jnp.ones((seq_len,), jnp.float32),
            "beta2": jnp.zeros((seq_len,), jnp.float32),
            "W1": W1, "b1": b1, "W2": W2, "b2": b2,
        })
    Wf, bf = _linear_params(keys[-1], embed_size, embed_size)
    return {"layers": layers, "Wf": Wf, "bf": bf}


# ======================================================================================
# Pure-JAX reference mirroring the PyTorch forward exactly
# ======================================================================================
def reference_self_attention(p, v, k, q, *, embed_size, heads, seq_len):
    N = q.shape[0]
    L = seq_len
    D = embed_size // heads

    def lin(x, W, b):
        return x @ W.T + b

    vr = lin(v.reshape(N, L, heads, D), p["Wv"], p["bv"])
    kr = lin(k.reshape(N, L, heads, D), p["Wk"], p["bk"])
    qr = lin(q.reshape(N, L, heads, D), p["Wq"], p["bq"])

    qe = jnp.einsum("nqhd,rd->nhqr", qr, p["E"][0])
    row = jnp.arange(L)[:, None]
    col = jnp.arange(L)[None, :]
    qe = jnp.where((col < (L - 1 - row))[None, None], 0.0, qe)          # _mask_positions
    padded = jnp.pad(qe, ((0, 0), (0, 0), (0, 0), (1, 0)))              # _skew
    s = padded.reshape(N, heads, L + 1, L)[:, :, 1:, :]

    qk = jnp.einsum("nqhd,nkhd->nhqk", qr, kr)
    qk = jnp.where((col > row)[None, None], qk, -1e20)                  # masked_fill(mask == 0)
    attn = jax.nn.softmax(qk / (embed_size ** 0.5), axis=3) + s
    z = jnp.einsum("nhql,nlhd->nqhd", attn, vr).reshape(N, L, heads * D)
    return z @ p["Wo"].T + p["bo"]


def _reference_batchnorm(y, gamma, beta, eps=1e-5):
    mean = jnp.mean(y, axis=(0, 2), keepdims=True)
    var = jnp.mean((y - mean) ** 2, axis=(0, 2), keepdims=True)
    return (y - mean) / jnp.sqrt(var + eps) * gamma.reshape(1, -1, 1) + beta.reshape(1, -1, 1)


def reference_encoder_module(params, x, *, embed_size, heads, seq_len):
    out = x
    for layer in params["layers"]:
        a = reference_self_attention(layer["attn"], x, x, x,
                                     embed_size=embed_size, heads=heads, seq_len=seq_len)
        h = _reference_batchnorm(a + x, layer["gamma1"], layer["beta1"])
        t = h @ layer["W1"].T + layer["b1"]
        t = jnp.where(t >= 0, t, 0.01 * t)                              # LeakyReLU
        f = t @ layer["W2"].T + layer["b2"]
        out = _reference_batchnorm(f + h, layer["gamma2"], layer["beta2"])
    return out @ params["Wf"].T + params["bf"]


# ======================================================================================
if __name__ == "__main__":
    N, heads, seq_len, embed_size = 2, 4, 8, 32
    forward_expansion, num_layers = 4, 2

    key = jax.random.PRNGKey(0)
    kparams, kx = jax.random.split(key)
    params = init_params(kparams, embed_size=embed_size, heads=heads, seq_len=seq_len,
                         forward_expansion=forward_expansion, num_layers=num_layers)
    x = jax.random.normal(kx, (N, seq_len, embed_size), jnp.float32)

    ref = reference_encoder_module(params, x, embed_size=embed_size, heads=heads,
                                   seq_len=seq_len)

    # Strict check: all-f32 kernel path vs pure-JAX reference.
    fwd_f32 = jax.jit(functools.partial(encoder_module_forward, heads=heads,
                                        forward_expansion=forward_expansion,
                                        compute_dtype=jnp.float32))
    out_f32 = jax.block_until_ready(fwd_f32(params, x))
    assert out_f32.shape == (N, seq_len, embed_size)
    assert jnp.allclose(out_f32, ref, atol=2e-3, rtol=2e-3), (
        "f32 Pallas path mismatch, max abs err = "
        f"{float(jnp.max(jnp.abs(out_f32 - ref)))}")

    # Fast path: bf16 MXU operands / bf16 inter-kernel activations with f32 accumulation
    # (looser tolerance by design).
    fwd_bf16 = jax.jit(functools.partial(encoder_module_forward, heads=heads,
                                         forward_expansion=forward_expansion,
                                         compute_dtype=jnp.bfloat16))
    out_bf16 = jax.block_until_ready(fwd_bf16(params, x)).astype(jnp.float32)
    assert jnp.allclose(out_bf16, ref, atol=1e-1, rtol=1e-1), (
        "bf16 Pallas path mismatch, max abs err = "
        f"{float(jnp.max(jnp.abs(out_bf16 - ref)))}")

    print("KERNEL_OK")
</pallas_src>

<mosaic_0001>
module attributes {stable_mosaic.version = 11 : i64} {
  func.func @_mhsa_kernel(%arg0: i32, %arg1: i32, %arg2: memref<1x8x32xf32, #tpu.memory_space<vmem>>, %arg3: memref<32x32xf32, #tpu.memory_space<vmem>>, %arg4: memref<1x32xf32, #tpu.memory_space<vmem>>, %arg5: memref<32x32xf32, #tpu.memory_space<vmem>>, %arg6: memref<1x32xf32, #tpu.memory_space<vmem>>, %arg7: memref<32x32xf32, #tpu.memory_space<vmem>>, %arg8: memref<1x32xf32, #tpu.memory_space<vmem>>, %arg9: memref<8x8xf32, #tpu.memory_space<vmem>>, %arg10: memref<32x32xf32, #tpu.memory_space<vmem>>, %arg11: memref<1x32xf32, #tpu.memory_space<vmem>>, %arg12: memref<1x8x32xf32, #tpu.memory_space<vmem>>, %arg13: memref<8x32xf32, #tpu.memory_space<vmem>>) attributes {dimension_semantics = [#tpu.dimension_semantics<parallel>, #tpu.dimension_semantics<parallel>], iteration_bounds = array<i64: 2, 1>, scalar_prefetch = 0 : i64, scratch_operands = 1 : i64, tpu.core_type = #tpu.core_type<tc>, window_params = [{transform_indices = @transform_0, window_bounds = array<i64: 1, 8, 32>}, {pipeline_mode = #tpu.pipeline_mode<synchronous>, transform_indices = @transform_1, window_bounds = array<i64: 32, 32>}, {pipeline_mode = #tpu.pipeline_mode<synchronous>, transform_indices = @transform_2, window_bounds = array<i64: 1, 32>}, {pipeline_mode = #tpu.pipeline_mode<synchronous>, transform_indices = @transform_3, window_bounds = array<i64: 32, 32>}, {pipeline_mode = #tpu.pipeline_mode<synchronous>, transform_indices = @transform_4, window_bounds = array<i64: 1, 32>}, {pipeline_mode = #tpu.pipeline_mode<synchronous>, transform_indices = @transform_5, window_bounds = array<i64: 32, 32>}, {pipeline_mode = #tpu.pipeline_mode<synchronous>, transform_indices = @transform_6, window_bounds = array<i64: 1, 32>}, {pipeline_mode = #tpu.pipeline_mode<synchronous>, transform_indices = @transform_7, window_bounds = array<i64: 8, 8>}, {pipeline_mode = #tpu.pipeline_mode<synchronous>, transform_indices = @transform_8, window_bounds = array<i64: 32, 32>}, {pipeline_mode = #tpu.pipeline_mode<synchronous>, transform_indices = @transform_9, window_bounds = array<i64: 1, 32>}, {transform_indices = @transform_10, window_bounds = array<i64: 1, 8, 32>}]} {
    %c8_i32 = arith.constant 8 : i32
    %0 = arith.muli %arg1, %c8_i32 : i32
    %1 = tpu.assume_multiple %0, 8 : i32
    %c0 = arith.constant 0 : index
    %c0_0 = arith.constant 0 : index
    %c0_1 = arith.constant 0 : index
    %2 = vector.load %arg2[%c0, %c0_0, %c0_1] : memref<1x8x32xf32, #tpu.memory_space<vmem>>, vector<1x8x32xf32>
    %3 = vector.shape_cast %2 : vector<1x8x32xf32> to vector<8x32xf32>
    %c0_2 = arith.constant 0 : index
    %4 = arith.index_cast %1 : i32 to index
    %c0_3 = arith.constant 0 : index
    %5 = vector.load %arg2[%c0_2, %4, %c0_3] : memref<1x8x32xf32, #tpu.memory_space<vmem>>, vector<1x8x32xf32>
    %6 = vector.shape_cast %5 : vector<1x8x32xf32> to vector<8x32xf32>
    %c0_4 = arith.constant 0 : index
    %c0_5 = arith.constant 0 : index
    %7 = vector.load %arg3[%c0_4, %c0_5] : memref<32x32xf32, #tpu.memory_space<vmem>>, vector<32x32xf32>
    %cst = arith.constant dense<0.000000e+00> : vector<8x32xf32>
    %8 = tpu.matmul %6, %7, %cst {dimension_numbers = #tpu.dot_dimension_numbers<[1], [0], [0], [1], [0, 0, 1, 1], [], []>} : vector<8x32xf32>, vector<32x32xf32>, vector<8x32xf32> -> vector<8x32xf32>
    %c0_6 = arith.constant 0 : index
    %c0_7 = arith.constant 0 : index
    %9 = vector.load %arg4[%c0_6, %c0_7] : memref<1x32xf32, #tpu.memory_space<vmem>>, vector<1x32xf32>
    %10 = vector.broadcast %9 : vector<1x32xf32> to vector<8x32xf32>
    %11 = arith.addf %8, %10 : vector<8x32xf32>
    %c0_8 = arith.constant 0 : index
    %c0_9 = arith.constant 0 : index
    %12 = vector.load %arg5[%c0_8, %c0_9] : memref<32x32xf32, #tpu.memory_space<vmem>>, vector<32x32xf32>
    %cst_10 = arith.constant dense<0.000000e+00> : vector<8x32xf32>
    %13 = tpu.matmul %3, %12, %cst_10 {dimension_numbers = #tpu.dot_dimension_numbers<[1], [0], [0], [1], [0, 0, 1, 1], [], []>} : vector<8x32xf32>, vector<32x32xf32>, vector<8x32xf32> -> vector<8x32xf32>
    %c0_11 = arith.constant 0 : index
    %c0_12 = arith.constant 0 : index
    %14 = vector.load %arg6[%c0_11, %c0_12] : memref<1x32xf32, #tpu.memory_space<vmem>>, vector<1x32xf32>
    %15 = vector.broadcast %14 : vector<1x32xf32> to vector<8x32xf32>
    %16 = arith.addf %13, %15 : vector<8x32xf32>
    %c0_13 = arith.constant 0 : index
    %c0_14 = arith.constant 0 : index
    %17 = vector.load %arg7[%c0_13, %c0_14] : memref<32x32xf32, #tpu.memory_space<vmem>>, vector<32x32xf32>
    %cst_15 = arith.constant dense<0.000000e+00> : vector<8x32xf32>
    %18 = tpu.matmul %3, %17, %cst_15 {dimension_numbers = #tpu.dot_dimension_numbers<[1], [0], [0], [1], [0, 0, 1, 1], [], []>} : vector<8x32xf32>, vector<32x32xf32>, vector<8x32xf32> -> vector<8x32xf32>
    %c0_16 = arith.constant 0 : index
    %c0_17 = arith.constant 0 : index
    %19 = vector.load %arg8[%c0_16, %c0_17] : memref<1x32xf32, #tpu.memory_space<vmem>>, vector<1x32xf32>
    %20 = vector.broadcast %19 : vector<1x32xf32> to vector<8x32xf32>
    %21 = arith.addf %18, %20 : vector<8x32xf32>
    %22 = tpu.iota {dimensions = array<i32: 0>} : vector<8x8xi32>
    %23 = vector.broadcast %1 : i32 to vector<8x8xi32>
    %24 = arith.addi %23, %22 : vector<8x8xi32>
    %25 = tpu.iota {dimensions = array<i32: 1>} : vector<8x8xi32>
    %26 = arith.cmpi sgt, %25, %24 : vector<8x8xi32>
    %27 = arith.cmpi sle, %25, %24 : vector<8x8xi32>
    %28 = tpu.iota {dimensions = array<i32: 0>} : vector<8x1xi32>
    %29 = vector.broadcast %1 : i32 to vector<8x1xi32>
    %30 = arith.addi %29, %28 : vector<8x1xi32>
    %c7_i32 = arith.constant 7 : i32
    %31 = vector.broadcast %c7_i32 : i32 to vector<8x1xi32>
    %32 = arith.subi %31, %30 : vector<8x1xi32>
    %c1_i32 = arith.constant 1 : i32
    %33 = vector.broadcast %c1_i32 : i32 to vector<8x1xi32>
    %34 = arith.andi %32, %33 : vector<8x1xi32>
    %c0_i32 = arith.constant 0 : i32
    %35 = vector.broadcast %c0_i32 : i32 to vector<8x1xi32>
    %36 = arith.cmpi ne, %34, %35 : vector<8x1xi32>
    %c2_i32 = arith.constant 2 : i32
    %37 = vector.broadcast %c2_i32 : i32 to vector<8x1xi32>
    %38 = arith.andi %32, %37 : vector<8x1xi32>
    %c0_i32_18 = arith.constant 0 : i32
    %39 = vector.broadcast %c0_i32_18 : i32 to vector<8x1xi32>
    %40 = arith.cmpi ne, %38, %39 : vector<8x1xi32>
    %c4_i32 = arith.constant 4 : i32
    %41 = vector.broadcast %c4_i32 : i32 to vector<8x1xi32>
    %42 = arith.andi %32, %41 : vector<8x1xi32>
    %c0_i32_19 = arith.constant 0 : i32
    %43 = vector.broadcast %c0_i32_19 : i32 to vector<8x1xi32>
    %44 = arith.cmpi ne, %42, %43 : vector<8x1xi32>
    %c0_20 = arith.constant 0 : index
    %c0_21 = arith.constant 0 : index
    %45 = vector.load %arg9[%c0_20, %c0_21] : memref<8x8xf32, #tpu.memory_space<vmem>>, vector<8x8xf32>
    %46 = vector.extract_strided_slice %11 {offsets = [0, 0], sizes = [8, 8], strides = [1, 1]} : vector<8x32xf32> to vector<8x8xf32>
    %47 = vector.extract_strided_slice %16 {offsets = [0, 0], sizes = [8, 8], strides = [1, 1]} : vector<8x32xf32> to vector<8x8xf32>
    %48 = vector.extract_strided_slice %21 {offsets = [0, 0], sizes = [8, 8], strides = [1, 1]} : vector<8x32xf32> to vector<8x8xf32>
    %cst_22 = arith.constant dense<0.000000e+00> : vector<8x8xf32>
    %49 = tpu.matmul %46, %47, %cst_22 {dimension_numbers = #tpu.dot_dimension_numbers<[1], [1], [0], [0], [0, 0, 1, 0], [], []>} : vector<8x8xf32>, vector<8x8xf32>, vector<8x8xf32> -> vector<8x8xf32>
    %cst_23 = arith.constant -1.000000e+20 : f32
    %50 = vector.broadcast %cst_23 : f32 to vector<8x8xf32>
    %51 = arith.select %26, %49, %50 : vector<8x8xi1>, vector<8x8xf32>
    %cst_24 = arith.constant dense<0xFF800000> : vector<8xf32>
    %52 = vector.multi_reduction <maximumf>, %51, %cst_24 [1] : vector<8x8xf32> to vector<8xf32>
    %53 = vector.shape_cast %52 : vector<8xf32> to vector<8x1xf32>
    %54 = vector.broadcast %53 : vector<8x1xf32> to vector<8x8xf32>
    %55 = arith.subf %51, %54 : vector<8x8xf32>
    %56 = math.exp %55 : vector<8x8xf32>
    %cst_25 = arith.constant dense<0.000000e+00> : vector<8xf32>
    %57 = vector.multi_reduction <add>, %56, %cst_25 [1] : vector<8x8xf32> to vector<8xf32>
    %58 = vector.shape_cast %57 : vector<8xf32> to vector<8x1xf32>
    %59 = tpu.reciprocal %58 : vector<8x1xf32> -> vector<8x1xf32>
    %60 = vector.broadcast %59 : vector<8x1xf32> to vector<8x8xf32>
    %61 = arith.mulf %56, %60 : vector<8x8xf32>
    %cst_26 = arith.constant dense<0.000000e+00> : vector<8x8xf32>
    %62 = tpu.matmul %46, %45, %cst_26 {dimension_numbers = #tpu.dot_dimension_numbers<[1], [1], [0], [0], [0, 0, 1, 0], [], []>} : vector<8x8xf32>, vector<8x8xf32>, vector<8x8xf32> -> vector<8x8xf32>
    %63 = vector.extract_strided_slice %62 {offsets = [0, 1], sizes = [8, 7], strides = [1, 1]} : vector<8x8xf32> to vector<8x7xf32>
    %64 = vector.extract_strided_slice %62 {offsets = [0, 0], sizes = [8, 1], strides = [1, 1]} : vector<8x8xf32> to vector<8x1xf32>
    %65 = tpu.concatenate %63, %64 in 1 : vector<8x7xf32>, vector<8x1xf32> -> vector<8x8xf32>
    %66 = vector.shape_cast %36 : vector<8x1xi1> to vector<8x1xi1>
    %67 = vector.broadcast %66 : vector<8x1xi1> to vector<8x8xi1>
    %68 = arith.select %67, %65, %62 : vector<8x8xi1>, vector<8x8xf32>
    %69 = vector.extract_strided_slice %68 {offsets = [0, 2], sizes = [8, 6], strides = [1, 1]} : vector<8x8xf32> to vector<8x6xf32>
    %70 = vector.extract_strided_slice %68 {offsets = [0, 0], sizes = [8, 2], strides = [1, 1]} : vector<8x8xf32> to vector<8x2xf32>
    %71 = tpu.concatenate %69, %70 in 1 : vector<8x6xf32>, vector<8x2xf32> -> vector<8x8xf32>
    %72 = vector.shape_cast %40 : vector<8x1xi1> to vector<8x1xi1>
    %73 = vector.broadcast %72 : vector<8x1xi1> to vector<8x8xi1>
    %74 = arith.select %73, %71, %68 : vector<8x8xi1>, vector<8x8xf32>
    %75 = vector.extract_strided_slice %74 {offsets = [0, 4], sizes = [8, 4], strides = [1, 1]} : vector<8x8xf32> to vector<8x4xf32>
    %76 = vector.extract_strided_slice %74 {offsets = [0, 0], sizes = [8, 4], strides = [1, 1]} : vector<8x8xf32> to vector<8x4xf32>
    %77 = tpu.concatenate %75, %76 in 1 : vector<8x4xf32>, vector<8x4xf32> -> vector<8x8xf32>
    %78 = vector.shape_cast %44 : vector<8x1xi1> to vector<8x1xi1>
    %79 = vector.broadcast %78 : vector<8x1xi1> to vector<8x8xi1>
    %80 = arith.select %79, %77, %74 : vector<8x8xi1>, vector<8x8xf32>
    %cst_27 = arith.constant 0.000000e+00 : f32
    %81 = vector.broadcast %cst_27 : f32 to vector<8x8xf32>
    %82 = arith.select %27, %80, %81 : vector<8x8xi1>, vector<8x8xf32>
    %83 = arith.addf %61, %82 : vector<8x8xf32>
    %cst_28 = arith.constant dense<0.000000e+00> : vector<8x8xf32>
    %84 = tpu.matmul %83, %48, %cst_28 {dimension_numbers = #tpu.dot_dimension_numbers<[1], [0], [0], [1], [0, 0, 1, 1], [], []>} : vector<8x8xf32>, vector<8x8xf32>, vector<8x8xf32> -> vector<8x8xf32>
    %c0_29 = arith.constant 0 : index
    %c0_30 = arith.constant 0 : index
    %85 = vector.load %arg13[%c0_29, %c0_30] : memref<8x32xf32, #tpu.memory_space<vmem>>, vector<8x8xf32>
    tpu.vector_store %arg13[%c0_29, %c0_30], %84 {strides = array<i32>} : memref<8x32xf32, #tpu.memory_space<vmem>>, vector<8x8xf32>,
    %86 = vector.extract_strided_slice %11 {offsets = [0, 8], sizes = [8, 8], strides = [1, 1]} : vector<8x32xf32> to vector<8x8xf32>
    %87 = vector.extract_strided_slice %16 {offsets = [0, 8], sizes = [8, 8], strides = [1, 1]} : vector<8x32xf32> to vector<8x8xf32>
    %88 = vector.extract_strided_slice %21 {offsets = [0, 8], sizes = [8, 8], strides = [1, 1]} : vector<8x32xf32> to vector<8x8xf32>
    %cst_31 = arith.constant dense<0.000000e+00> : vector<8x8xf32>
    %89 = tpu.matmul %86, %87, %cst_31 {dimension_numbers = #tpu.dot_dimension_numbers<[1], [1], [0], [0], [0, 0, 1, 0], [], []>} : vector<8x8xf32>, vector<8x8xf32>, vector<8x8xf32> -> vector<8x8xf32>
    %cst_32 = arith.constant -1.000000e+20 : f32
    %90 = vector.broadcast %cst_32 : f32 to vector<8x8xf32>
    %91 = arith.select %26, %89, %90 : vector<8x8xi1>, vector<8x8xf32>
    %cst_33 = arith.constant dense<0xFF800000> : vector<8xf32>
    %92 = vector.multi_reduction <maximumf>, %91, %cst_33 [1] : vector<8x8xf32> to vector<8xf32>
    %93 = vector.shape_cast %92 : vector<8xf32> to vector<8x1xf32>
    %94 = vector.broadcast %93 : vector<8x1xf32> to vector<8x8xf32>
    %95 = arith.subf %91, %94 : vector<8x8xf32>
    %96 = math.exp %95 : vector<8x8xf32>
    %cst_34 = arith.constant dense<0.000000e+00> : vector<8xf32>
    %97 = vector.multi_reduction <add>, %96, %cst_34 [1] : vector<8x8xf32> to vector<8xf32>
    %98 = vector.shape_cast %97 : vector<8xf32> to vector<8x1xf32>
    %99 = tpu.reciprocal %98 : vector<8x1xf32> -> vector<8x1xf32>
    %100 = vector.broadcast %99 : vector<8x1xf32> to vector<8x8xf32>
    %101 = arith.mulf %96, %100 : vector<8x8xf32>
    %cst_35 = arith.constant dense<0.000000e+00> : vector<8x8xf32>
    %102 = tpu.matmul %86, %45, %cst_35 {dimension_numbers = #tpu.dot_dimension_numbers<[1], [1], [0], [0], [0, 0, 1, 0], [], []>} : vector<8x8xf32>, vector<8x8xf32>, vector<8x8xf32> -> vector<8x8xf32>
    %103 = vector.extract_strided_slice %102 {offsets = [0, 1], sizes = [8, 7], strides = [1, 1]} : vector<8x8xf32> to vector<8x7xf32>
    %104 = vector.extract_strided_slice %102 {offsets = [0, 0], sizes = [8, 1], strides = [1, 1]} : vector<8x8xf32> to vector<8x1xf32>
    %105 = tpu.concatenate %103, %104 in 1 : vector<8x7xf32>, vector<8x1xf32> -> vector<8x8xf32>
    %106 = vector.shape_cast %36 : vector<8x1xi1> to vector<8x1xi1>
    %107 = vector.broadcast %106 : vector<8x1xi1> to vector<8x8xi1>
    %108 = arith.select %107, %105, %102 : vector<8x8xi1>, vector<8x8xf32>
    %109 = vector.extract_strided_slice %108 {offsets = [0, 2], sizes = [8, 6], strides = [1, 1]} : vector<8x8xf32> to vector<8x6xf32>
    %110 = vector.extract_strided_slice %108 {offsets = [0, 0], sizes = [8, 2], strides = [1, 1]} : vector<8x8xf32> to vector<8x2xf32>
    %111 = tpu.concatenate %109, %110 in 1 : vector<8x6xf32>, vector<8x2xf32> -> vector<8x8xf32>
    %112 = vector.shape_cast %40 : vector<8x1xi1> to vector<8x1xi1>
    %113 = vector.broadcast %112 : vector<8x1xi1> to vector<8x8xi1>
    %114 = arith.select %113, %111, %108 : vector<8x8xi1>, vector<8x8xf32>
    %115 = vector.extract_strided_slice %114 {offsets = [0, 4], sizes = [8, 4], strides = [1, 1]} : vector<8x8xf32> to vector<8x4xf32>
    %116 = vector.extract_strided_slice %114 {offsets = [0, 0], sizes = [8, 4], strides = [1, 1]} : vector<8x8xf32> to vector<8x4xf32>
    %117 = tpu.concatenate %115, %116 in 1 : vector<8x4xf32>, vector<8x4xf32> -> vector<8x8xf32>
    %118 = vector.shape_cast %44 : vector<8x1xi1> to vector<8x1xi1>
    %119 = vector.broadcast %118 : vector<8x1xi1> to vector<8x8xi1>
    %120 = arith.select %119, %117, %114 : vector<8x8xi1>, vector<8x8xf32>
    %cst_36 = arith.constant 0.000000e+00 : f32
    %121 = vector.broadcast %cst_36 : f32 to vector<8x8xf32>
    %122 = arith.select %27, %120, %121 : vector<8x8xi1>, vector<8x8xf32>
    %123 = arith.addf %101, %122 : vector<8x8xf32>
    %cst_37 = arith.constant dense<0.000000e+00> : vector<8x8xf32>
    %124 = tpu.matmul %123, %88, %cst_37 {dimension_numbers = #tpu.dot_dimension_numbers<[1], [0], [0], [1], [0, 0, 1, 1], [], []>} : vector<8x8xf32>, vector<8x8xf32>, vector<8x8xf32> -> vector<8x8xf32>
    %c0_38 = arith.constant 0 : index
    %c8 = arith.constant 8 : index
    %125 = vector.load %arg13[%c0_38, %c8] : memref<8x32xf32, #tpu.memory_space<vmem>>, vector<8x8xf32>
    tpu.vector_store %arg13[%c0_38, %c8], %124 {strides = array<i32>} : memref<8x32xf32, #tpu.memory_space<vmem>>, vector<8x8xf32>,
    %126 = vector.extract_strided_slice %11 {offsets = [0, 16], sizes = [8, 8], strides = [1, 1]} : vector<8x32xf32> to vector<8x8xf32>
    %127 = vector.extract_strided_slice %16 {offsets = [0, 16], sizes = [8, 8], strides = [1, 1]} : vector<8x32xf32> to vector<8x8xf32>
    %128 = vector.extract_strided_slice %21 {offsets = [0, 16], sizes = [8, 8], strides = [1, 1]} : vector<8x32xf32> to vector<8x8xf32>
    %cst_39 = arith.constant dense<0.000000e+00> : vector<8x8xf32>
    %129 = tpu.matmul %126, %127, %cst_39 {dimension_numbers = #tpu.dot_dimension_numbers<[1], [1], [0], [0], [0, 0, 1, 0], [], []>} : vector<8x8xf32>, vector<8x8xf32>, vector<8x8xf32> -> vector<8x8xf32>
    %cst_40 = arith.constant -1.000000e+20 : f32
    %130 = vector.broadcast %cst_40 : f32 to vector<8x8xf32>
    %131 = arith.select %26, %129, %130 : vector<8x8xi1>, vector<8x8xf32>
    %cst_41 = arith.constant dense<0xFF800000> : vector<8xf32>
    %132 = vector.multi_reduction <maximumf>, %131, %cst_41 [1] : vector<8x8xf32> to vector<8xf32>
    %133 = vector.shape_cast %132 : vector<8xf32> to vector<8x1xf32>
    %134 = vector.broadcast %133 : vector<8x1xf32> to vector<8x8xf32>
    %135 = arith.subf %131, %134 : vector<8x8xf32>
    %136 = math.exp %135 : vector<8x8xf32>
    %cst_42 = arith.constant dense<0.000000e+00> : vector<8xf32>
    %137 = vector.multi_reduction <add>, %136, %cst_42 [1] : vector<8x8xf32> to vector<8xf32>
    %138 = vector.shape_cast %137 : vector<8xf32> to vector<8x1xf32>
    %139 = tpu.reciprocal %138 : vector<8x1xf32> -> vector<8x1xf32>
    %140 = vector.broadcast %139 : vector<8x1xf32> to vector<8x8xf32>
    %141 = arith.mulf %136, %140 : vector<8x8xf32>
    %cst_43 = arith.constant dense<0.000000e+00> : vector<8x8xf32>
    %142 = tpu.matmul %126, %45, %cst_43 {dimension_numbers = #tpu.dot_dimension_numbers<[1], [1], [0], [0], [0, 0, 1, 0], [], []>} : vector<8x8xf32>, vector<8x8xf32>, vector<8x8xf32> -> vector<8x8xf32>
    %143 = vector.extract_strided_slice %142 {offsets = [0, 1], sizes = [8, 7], strides = [1, 1]} : vector<8x8xf32> to vector<8x7xf32>
    %144 = vector.extract_strided_slice %142 {offsets = [0, 0], sizes = [8, 1], strides = [1, 1]} : vector<8x8xf32> to vector<8x1xf32>
    %145 = tpu.concatenate %143, %144 in 1 : vector<8x7xf32>, vector<8x1xf32> -> vector<8x8xf32>
    %146 = vector.shape_cast %36 : vector<8x1xi1> to vector<8x1xi1>
    %147 = vector.broadcast %146 : vector<8x1xi1> to vector<8x8xi1>
    %148 = arith.select %147, %145, %142 : vector<8x8xi1>, vector<8x8xf32>
    %149 = vector.extract_strided_slice %148 {offsets = [0, 2], sizes = [8, 6], strides = [1, 1]} : vector<8x8xf32> to vector<8x6xf32>
    %150 = vector.extract_strided_slice %148 {offsets = [0, 0], sizes = [8, 2], strides = [1, 1]} : vector<8x8xf32> to vector<8x2xf32>
    %151 = tpu.concatenate %149, %150 in 1 : vector<8x6xf32>, vector<8x2xf32> -> vector<8x8xf32>
    %152 = vector.shape_cast %40 : vector<8x1xi1> to vector<8x1xi1>
    %153 = vector.broadcast %152 : vector<8x1xi1> to vector<8x8xi1>
    %154 = arith.select %153, %151, %148 : vector<8x8xi1>, vector<8x8xf32>
    %155 = vector.extract_strided_slice %154 {offsets = [0, 4], sizes = [8, 4], strides = [1, 1]} : vector<8x8xf32> to vector<8x4xf32>
    %156 = vector.extract_strided_slice %154 {offsets = [0, 0], sizes = [8, 4], strides = [1, 1]} : vector<8x8xf32> to vector<8x4xf32>
    %157 = tpu.concatenate %155, %156 in 1 : vector<8x4xf32>, vector<8x4xf32> -> vector<8x8xf32>
    %158 = vector.shape_cast %44 : vector<8x1xi1> to vector<8x1xi1>
    %159 = vector.broadcast %158 : vector<8x1xi1> to vector<8x8xi1>
    %160 = arith.select %159, %157, %154 : vector<8x8xi1>, vector<8x8xf32>
    %cst_44 = arith.constant 0.000000e+00 : f32
    %161 = vector.broadcast %cst_44 : f32 to vector<8x8xf32>
    %162 = arith.select %27, %160, %161 : vector<8x8xi1>, vector<8x8xf32>
    %163 = arith.addf %141, %162 : vector<8x8xf32>
    %cst_45 = arith.constant dense<0.000000e+00> : vector<8x8xf32>
    %164 = tpu.matmul %163, %128, %cst_45 {dimension_numbers = #tpu.dot_dimension_numbers<[1], [0], [0], [1], [0, 0, 1, 1], [], []>} : vector<8x8xf32>, vector<8x8xf32>, vector<8x8xf32> -> vector<8x8xf32>
    %c0_46 = arith.constant 0 : index
    %c16 = arith.constant 16 : index
    %165 = vector.load %arg13[%c0_46, %c16] : memref<8x32xf32, #tpu.memory_space<vmem>>, vector<8x8xf32>
    tpu.vector_store %arg13[%c0_46, %c16], %164 {strides = array<i32>} : memref<8x32xf32, #tpu.memory_space<vmem>>, vector<8x8xf32>,
    %166 = vector.extract_strided_slice %11 {offsets = [0, 24], sizes = [8, 8], strides = [1, 1]} : vector<8x32xf32> to vector<8x8xf32>
    %167 = vector.extract_strided_slice %16 {offsets = [0, 24], sizes = [8, 8], strides = [1, 1]} : vector<8x32xf32> to vector<8x8xf32>
    %168 = vector.extract_strided_slice %21 {offsets = [0, 24], sizes = [8, 8], strides = [1, 1]} : vector<8x32xf32> to vector<8x8xf32>
    %cst_47 = arith.constant dense<0.000000e+00> : vector<8x8xf32>
    %169 = tpu.matmul %166, %167, %cst_47 {dimension_numbers = #tpu.dot_dimension_numbers<[1], [1], [0], [0], [0, 0, 1, 0], [], []>} : vector<8x8xf32>, vector<8x8xf32>, vector<8x8xf32> -> vector<8x8xf32>
    %cst_48 = arith.constant -1.000000e+20 : f32
    %170 = vector.broadcast %cst_48 : f32 to vector<8x8xf32>
    %171 = arith.select %26, %169, %170 : vector<8x8xi1>, vector<8x8xf32>
    %cst_49 = arith.constant dense<0xFF800000> : vector<8xf32>
    %172 = vector.multi_reduction <maximumf>, %171, %cst_49 [1] : vector<8x8xf32> to vector<8xf32>
    %173 = vector.shape_cast %172 : vector<8xf32> to vector<8x1xf32>
    %174 = vector.broadcast %173 : vector<8x1xf32> to vector<8x8xf32>
    %175 = arith.subf %171, %174 : vector<8x8xf32>
    %176 = math.exp %175 : vector<8x8xf32>
    %cst_50 = arith.constant dense<0.000000e+00> : vector<8xf32>
    %177 = vector.multi_reduction <add>, %176, %cst_50 [1] : vector<8x8xf32> to vector<8xf32>
    %178 = vector.shape_cast %177 : vector<8xf32> to vector<8x1xf32>
    %179 = tpu.reciprocal %178 : vector<8x1xf32> -> vector<8x1xf32>
    %180 = vector.broadcast %179 : vector<8x1xf32> to vector<8x8xf32>
    %181 = arith.mulf %176, %180 : vector<8x8xf32>
    %cst_51 = arith.constant dense<0.000000e+00> : vector<8x8xf32>
    %182 = tpu.matmul %166, %45, %cst_51 {dimension_numbers = #tpu.dot_dimension_numbers<[1], [1], [0], [0], [0, 0, 1, 0], [], []>} : vector<8x8xf32>, vector<8x8xf32>, vector<8x8xf32> -> vector<8x8xf32>
    %183 = vector.extract_strided_slice %182 {offsets = [0, 1], sizes = [8, 7], strides = [1, 1]} : vector<8x8xf32> to vector<8x7xf32>
    %184 = vector.extract_strided_slice %182 {offsets = [0, 0], sizes = [8, 1], strides = [1, 1]} : vector<8x8xf32> to vector<8x1xf32>
    %185 = tpu.concatenate %183, %184 in 1 : vector<8x7xf32>, vector<8x1xf32> -> vector<8x8xf32>
    %186 = vector.shape_cast %36 : vector<8x1xi1> to vector<8x1xi1>
    %187 = vector.broadcast %186 : vector<8x1xi1> to vector<8x8xi1>
    %188 = arith.select %187, %185, %182 : vector<8x8xi1>, vector<8x8xf32>
    %189 = vector.extract_strided_slice %188 {offsets = [0, 2], sizes = [8, 6], strides = [1, 1]} : vector<8x8xf32> to vector<8x6xf32>
    %190 = vector.extract_strided_slice %188 {offsets = [0, 0], sizes = [8, 2], strides = [1, 1]} : vector<8x8xf32> to vector<8x2xf32>
    %191 = tpu.concatenate %189, %190 in 1 : vector<8x6xf32>, vector<8x2xf32> -> vector<8x8xf32>
    %192 = vector.shape_cast %40 : vector<8x1xi1> to vector<8x1xi1>
    %193 = vector.broadcast %192 : vector<8x1xi1> to vector<8x8xi1>
    %194 = arith.select %193, %191, %188 : vector<8x8xi1>, vector<8x8xf32>
    %195 = vector.extract_strided_slice %194 {offsets = [0, 4], sizes = [8, 4], strides = [1, 1]} : vector<8x8xf32> to vector<8x4xf32>
    %196 = vector.extract_strided_slice %194 {offsets = [0, 0], sizes = [8, 4], strides = [1, 1]} : vector<8x8xf32> to vector<8x4xf32>
    %197 = tpu.concatenate %195, %196 in 1 : vector<8x4xf32>, vector<8x4xf32> -> vector<8x8xf32>
    %198 = vector.shape_cast %44 : vector<8x1xi1> to vector<8x1xi1>
    %199 = vector.broadcast %198 : vector<8x1xi1> to vector<8x8xi1>
    %200 = arith.select %199, %197, %194 : vector<8x8xi1>, vector<8x8xf32>
    %cst_52 = arith.constant 0.000000e+00 : f32
    %201 = vector.broadcast %cst_52 : f32 to vector<8x8xf32>
    %202 = arith.select %27, %200, %201 : vector<8x8xi1>, vector<8x8xf32>
    %203 = arith.addf %181, %202 : vector<8x8xf32>
    %cst_53 = arith.constant dense<0.000000e+00> : vector<8x8xf32>
    %204 = tpu.matmul %203, %168, %cst_53 {dimension_numbers = #tpu.dot_dimension_numbers<[1], [0], [0], [1], [0, 0, 1, 1], [], []>} : vector<8x8xf32>, vector<8x8xf32>, vector<8x8xf32> -> vector<8x8xf32>
    %c0_54 = arith.constant 0 : index
    %c24 = arith.constant 24 : index
    %205 = vector.load %arg13[%c0_54, %c24] : memref<8x32xf32, #tpu.memory_space<vmem>>, vector<8x8xf32>
    tpu.vector_store %arg13[%c0_54, %c24], %204 {strides = array<i32>} : memref<8x32xf32, #tpu.memory_space<vmem>>, vector<8x8xf32>,
    %c0_55 = arith.constant 0 : index
    %c0_56 = arith.constant 0 : index
    %206 = vector.load %arg13[%c0_55, %c0_56] : memref<8x32xf32, #tpu.memory_space<vmem>>, vector<8x32xf32>
    %c0_57 = arith.constant 0 : index
    %c0_58 = arith.constant 0 : index
    %207 = vector.load %arg10[%c0_57, %c0_58] : memref<32x32xf32, #tpu.memory_space<vmem>>, vector<32x32xf32>
    %cst_59 = arith.constant dense<0.000000e+00> : vector<8x32xf32>
    %208 = tpu.matmul %206, %207, %cst_59 {dimension_numbers = #tpu.dot_dimension_numbers<[1], [0], [0], [1], [0, 0, 1, 1], [], []>} : vector<8x32xf32>, vector<32x32xf32>, vector<8x32xf32> -> vector<8x32xf32>
    %c0_60 = arith.constant 0 : index
    %c0_61 = arith.constant 0 : index
    %209 = vector.load %arg11[%c0_60, %c0_61] : memref<1x32xf32, #tpu.memory_space<vmem>>, vector<1x32xf32>
    %210 = vector.broadcast %209 : vector<1x32xf32> to vector<8x32xf32>
    %211 = arith.addf %208, %210 : vector<8x32xf32>
    %c0_62 = arith.constant 0 : index
    %c0_63 = arith.constant 0 : index
    %c0_64 = arith.constant 0 : index
    %212 = vector.load %arg12[%c0_62, %c0_63, %c0_64] : memref<1x8x32xf32, #tpu.memory_space<vmem>>, vector<1x8x32xf32>
    %213 = vector.shape_cast %212 : vector<1x8x32xf32> to vector<8x32xf32>
    %214 = vector.shape_cast %211 : vector<8x32xf32> to vector<1x8x32xf32>
    tpu.vector_store %arg12[%c0_62, %c0_63, %c0_64], %214 {strides = array<i32>} : memref<1x8x32xf32, #tpu.memory_space<vmem>>, vector<1x8x32xf32>,
    return
  }
  func.func @transform_0(%arg0: i32, %arg1: i32) -> (i32, i32, i32) {
    %c0_i32 = arith.constant 0 : i32
    %c0_i32_0 = arith.constant 0 : i32
    %c0_i32_1 = arith.constant 0 : i32
    return %arg0, %c0_i32, %c0_i32_0 : i32, i32, i32
  }
  func.func @transform_1(%arg0: i32, %arg1: i32) -> (i32, i32) {
    %c0_i32 = arith.constant 0 : i32
    %c0_i32_0 = arith.constant 0 : i32
    %c0_i32_1 = arith.constant 0 : i32
    return %c0_i32, %c0_i32_0 : i32, i32
  }
  func.func @transform_2(%arg0: i32, %arg1: i32) -> (i32, i32) {
    %c0_i32 = arith.constant 0 : i32
    %c0_i32_0 = arith.constant 0 : i32
    %c0_i32_1 = arith.constant 0 : i32
    return %c0_i32, %c0_i32_0 : i32, i32
  }
  func.func @transform_3(%arg0: i32, %arg1: i32) -> (i32, i32) {
    %c0_i32 = arith.constant 0 : i32
    %c0_i32_0 = arith.constant 0 : i32
    %c0_i32_1 = arith.constant 0 : i32
    return %c0_i32, %c0_i32_0 : i32, i32
  }
  func.func @transform_4(%arg0: i32, %arg1: i32) -> (i32, i32) {
    %c0_i32 = arith.constant 0 : i32
    %c0_i32_0 = arith.constant 0 : i32
    %c0_i32_1 = arith.constant 0 : i32
    return %c0_i32, %c0_i32_0 : i32, i32
  }
  func.func @transform_5(%arg0: i32, %arg1: i32) -> (i32, i32) {
    %c0_i32 = arith.constant 0 : i32
    %c0_i32_0 = arith.constant 0 : i32
    %c0_i32_1 = arith.constant 0 : i32
    return %c0_i32, %c0_i32_0 : i32, i32
  }
  func.func @transform_6(%arg0: i32, %arg1: i32) -> (i32, i32) {
    %c0_i32 = arith.constant 0 : i32
    %c0_i32_0 = arith.constant 0 : i32
    %c0_i32_1 = arith.constant 0 : i32
    return %c0_i32, %c0_i32_0 : i32, i32
  }
  func.func @transform_7(%arg0: i32, %arg1: i32) -> (i32, i32) {
    %c0_i32 = arith.constant 0 : i32
    %c0_i32_0 = arith.constant 0 : i32
    %c0_i32_1 = arith.constant 0 : i32
    return %c0_i32, %c0_i32_0 : i32, i32
  }
  func.func @transform_8(%arg0: i32, %arg1: i32) -> (i32, i32) {
    %c0_i32 = arith.constant 0 : i32
    %c0_i32_0 = arith.constant 0 : i32
    %c0_i32_1 = arith.constant 0 : i32
    return %c0_i32, %c0_i32_0 : i32, i32
  }
  func.func @transform_9(%arg0: i32, %arg1: i32) -> (i32, i32) {
    %c0_i32 = arith.constant 0 : i32
    %c0_i32_0 = arith.constant 0 : i32
    %c0_i32_1 = arith.constant 0 : i32
    return %c0_i32, %c0_i32_0 : i32, i32
  }
  func.func @transform_10(%arg0: i32, %arg1: i32) -> (i32, i32, i32) {
    %c0_i32 = arith.constant 0 : i32
    %c0_i32_0 = arith.constant 0 : i32
    return %arg0, %arg1, %c0_i32 : i32, i32, i32
  }
}

module attributes {stable_mosaic.version = 11 : i64} {
  func.func @_encoder_tail_final_kernel(%arg0: i32, %arg1: memref<2x8x32xf32, #tpu.memory_space<vmem>>, %arg2: memref<2x8x32xf32, #tpu.memory_space<vmem>>, %arg3: memref<1x8x1xf32, #tpu.memory_space<vmem>>, %arg4: memref<1x8x1xf32, #tpu.memory_space<vmem>>, %arg5: memref<1x8x1xf32, #tpu.memory_space<vmem>>, %arg6: memref<1x8x1xf32, #tpu.memory_space<vmem>>, %arg7: memref<32x128xf32, #tpu.memory_space<vmem>>, %arg8: memref<1x128xf32, #tpu.memory_space<vmem>>, %arg9: memref<128x32xf32, #tpu.memory_space<vmem>>, %arg10: memref<1x32xf32, #tpu.memory_space<vmem>>, %arg11: memref<32x32xf32, #tpu.memory_space<vmem>>, %arg12: memref<1x32xf32, #tpu.memory_space<vmem>>, %arg13: memref<2x8x32xf32, #tpu.memory_space<vmem>>) attributes {dimension_semantics = [#tpu.dimension_semantics<parallel>], iteration_bounds = array<i64: 1>, scalar_prefetch = 0 : i64, scratch_operands = 0 : i64, tpu.core_type = #tpu.core_type<tc>, window_params = [{transform_indices = @transform_0, window_bounds = array<i64: 2, 8, 32>}, {transform_indices = @transform_1, window_bounds = array<i64: 2, 8, 32>}, {transform_indices = @transform_2, window_bounds = array<i64: 1, 8, 1>}, {transform_indices = @transform_3, window_bounds = array<i64: 1, 8, 1>}, {transform_indices = @transform_4, window_bounds = array<i64: 1, 8, 1>}, {transform_indices = @transform_5, window_bounds = array<i64: 1, 8, 1>}, {pipeline_mode = #tpu.pipeline_mode<synchronous>, transform_indices = @transform_6, window_bounds = array<i64: 32, 128>}, {pipeline_mode = #tpu.pipeline_mode<synchronous>, transform_indices = @transform_7, window_bounds = array<i64: 1, 128>}, {pipeline_mode = #tpu.pipeline_mode<synchronous>, transform_indices = @transform_8, window_bounds = array<i64: 128, 32>}, {pipeline_mode = #tpu.pipeline_mode<synchronous>, transform_indices = @transform_9, window_bounds = array<i64: 1, 32>}, {pipeline_mode = #tpu.pipeline_mode<synchronous>, transform_indices = @transform_10, window_bounds = array<i64: 32, 32>}, {pipeline_mode = #tpu.pipeline_mode<synchronous>, transform_indices = @transform_11, window_bounds = array<i64: 1, 32>}, {transform_indices = @transform_12, window_bounds = array<i64: 2, 8, 32>}]} {
    %c0 = arith.constant 0 : index
    %c0_0 = arith.constant 0 : index
    %c0_1 = arith.constant 0 : index
    %0 = vector.load %arg1[%c0, %c0_0, %c0_1] : memref<2x8x32xf32, #tpu.memory_space<vmem>>, vector<2x8x32xf32>
    %c0_2 = arith.constant 0 : index
    %c0_3 = arith.constant 0 : index
    %c0_4 = arith.constant 0 : index
    %1 = vector.load %arg2[%c0_2, %c0_3, %c0_4] : memref<2x8x32xf32, #tpu.memory_space<vmem>>, vector<2x8x32xf32>
    %2 = arith.addf %0, %1 : vector<2x8x32xf32>
    %cst = arith.constant dense<0.000000e+00> : vector<2x8xf32>
    %3 = vector.multi_reduction <add>, %2, %cst [2] : vector<2x8x32xf32> to vector<2x8xf32>
    %4 = vector.shape_cast %3 : vector<2x8xf32> to vector<2x8x1xf32>
    %cst_5 = arith.constant dense<0.000000e+00> : vector<8x1xf32>
    %5 = vector.multi_reduction <add>, %4, %cst_5 [0] : vector<2x8x1xf32> to vector<8x1xf32>
    %6 = vector.shape_cast %5 : vector<8x1xf32> to vector<1x8x1xf32>
    %cst_6 = arith.constant 6.400000e+01 : f32
    %7 = vector.broadcast %cst_6 : f32 to vector<1x8x1xf32>
    %8 = arith.divf %6, %7 : vector<1x8x1xf32>
    %9 = vector.broadcast %8 : vector<1x8x1xf32> to vector<2x8x32xf32>
    %10 = arith.subf %2, %9 : vector<2x8x32xf32>
    %11 = arith.mulf %10, %10 : vector<2x8x32xf32>
    %cst_7 = arith.constant dense<0.000000e+00> : vector<2x8xf32>
    %12 = vector.multi_reduction <add>, %11, %cst_7 [2] : vector<2x8x32xf32> to vector<2x8xf32>
    %13 = vector.shape_cast %12 : vector<2x8xf32> to vector<2x8x1xf32>
    %cst_8 = arith.constant dense<0.000000e+00> : vector<8x1xf32>
    %14 = vector.multi_reduction <add>, %13, %cst_8 [0] : vector<2x8x1xf32> to vector<8x1xf32>
    %15 = vector.shape_cast %14 : vector<8x1xf32> to vector<1x8x1xf32>
    %cst_9 = arith.constant 6.400000e+01 : f32
    %16 = vector.broadcast %cst_9 : f32 to vector<1x8x1xf32>
    %17 = arith.divf %15, %16 : vector<1x8x1xf32>
    %cst_10 = arith.constant 9.99999974E-6 : f32
    %18 = vector.broadcast %cst_10 : f32 to vector<1x8x1xf32>
    %19 = arith.addf %17, %18 : vector<1x8x1xf32>
    %20 = math.rsqrt %19 : vector<1x8x1xf32>
    %21 = vector.broadcast %20 : vector<1x8x1xf32> to vector<2x8x32xf32>
    %22 = arith.mulf %10, %21 : vector<2x8x32xf32>
    %c0_11 = arith.constant 0 : index
    %c0_12 = arith.constant 0 : index
    %c0_13 = arith.constant 0 : index
    %23 = vector.load %arg3[%c0_11, %c0_12, %c0_13] : memref<1x8x1xf32, #tpu.memory_space<vmem>>, vector<1x8x1xf32>
    %24 = vector.broadcast %23 : vector<1x8x1xf32> to vector<2x8x32xf32>
    %25 = arith.mulf %22, %24 : vector<2x8x32xf32>
    %c0_14 = arith.constant 0 : index
    %c0_15 = arith.constant 0 : index
    %c0_16 = arith.constant 0 : index
    %26 = vector.load %arg4[%c0_14, %c0_15, %c0_16] : memref<1x8x1xf32, #tpu.memory_space<vmem>>, vector<1x8x1xf32>
    %27 = vector.broadcast %26 : vector<1x8x1xf32> to vector<2x8x32xf32>
    %28 = arith.addf %25, %27 : vector<2x8x32xf32>
    %29 = vector.shape_cast %28 : vector<2x8x32xf32> to vector<16x32xf32>
    %c0_17 = arith.constant 0 : index
    %c0_18 = arith.constant 0 : index
    %30 = vector.load %arg7[%c0_17, %c0_18] : memref<32x128xf32, #tpu.memory_space<vmem>>, vector<32x128xf32>
    %cst_19 = arith.constant dense<0.000000e+00> : vector<16x128xf32>
    %31 = tpu.matmul %29, %30, %cst_19 {dimension_numbers = #tpu.dot_dimension_numbers<[1], [0], [0], [1], [0, 0, 1, 1], [], []>} : vector<16x32xf32>, vector<32x128xf32>, vector<16x128xf32> -> vector<16x128xf32>
    %c0_20 = arith.constant 0 : index
    %c0_21 = arith.constant 0 : index
    %32 = vector.load %arg8[%c0_20, %c0_21] : memref<1x128xf32, #tpu.memory_space<vmem>>, vector<1x128xf32>
    %33 = vector.broadcast %32 : vector<1x128xf32> to vector<16x128xf32>
    %34 = arith.addf %31, %33 : vector<16x128xf32>
    %cst_22 = arith.constant 0.000000e+00 : f32
    %35 = vector.broadcast %cst_22 : f32 to vector<16x128xf32>
    %36 = arith.cmpf oge, %34, %35 : vector<16x128xf32>
    %cst_23 = arith.constant 0.00999999977 : f32
    %37 = vector.broadcast %cst_23 : f32 to vector<16x128xf32>
    %38 = arith.mulf %37, %34 : vector<16x128xf32>
    %39 = arith.select %36, %34, %38 : vector<16x128xi1>, vector<16x128xf32>
    %c0_24 = arith.constant 0 : index
    %c0_25 = arith.constant 0 : index
    %40 = vector.load %arg9[%c0_24, %c0_25] : memref<128x32xf32, #tpu.memory_space<vmem>>, vector<128x32xf32>
    %cst_26 = arith.constant dense<0.000000e+00> : vector<16x32xf32>
    %41 = tpu.matmul %39, %40, %cst_26 {dimension_numbers = #tpu.dot_dimension_numbers<[1], [0], [0], [1], [0, 0, 1, 1], [], []>} : vector<16x128xf32>, vector<128x32xf32>, vector<16x32xf32> -> vector<16x32xf32>
    %c0_27 = arith.constant 0 : index
    %c0_28 = arith.constant 0 : index
    %42 = vector.load %arg10[%c0_27, %c0_28] : memref<1x32xf32, #tpu.memory_space<vmem>>, vector<1x32xf32>
    %43 = vector.broadcast %42 : vector<1x32xf32> to vector<16x32xf32>
    %44 = arith.addf %41, %43 : vector<16x32xf32>
    %45 = arith.addf %44, %29 : vector<16x32xf32>
    %46 = vector.shape_cast %45 : vector<16x32xf32> to vector<2x8x32xf32>
    %cst_29 = arith.constant dense<0.000000e+00> : vector<2x8xf32>
    %47 = vector.multi_reduction <add>, %46, %cst_29 [2] : vector<2x8x32xf32> to vector<2x8xf32>
    %48 = vector.shape_cast %47 : vector<2x8xf32> to vector<2x8x1xf32>
    %cst_30 = arith.constant dense<0.000000e+00> : vector<8x1xf32>
    %49 = vector.multi_reduction <add>, %48, %cst_30 [0] : vector<2x8x1xf32> to vector<8x1xf32>
    %50 = vector.shape_cast %49 : vector<8x1xf32> to vector<1x8x1xf32>
    %cst_31 = arith.constant 6.400000e+01 : f32
    %51 = vector.broadcast %cst_31 : f32 to vector<1x8x1xf32>
    %52 = arith.divf %50, %51 : vector<1x8x1xf32>
    %53 = vector.broadcast %52 : vector<1x8x1xf32> to vector<2x8x32xf32>
    %54 = arith.subf %46, %53 : vector<2x8x32xf32>
    %55 = arith.mulf %54, %54 : vector<2x8x32xf32>
    %cst_32 = arith.constant dense<0.000000e+00> : vector<2x8xf32>
    %56 = vector.multi_reduction <add>, %55, %cst_32 [2] : vector<2x8x32xf32> to vector<2x8xf32>
    %57 = vector.shape_cast %56 : vector<2x8xf32> to vector<2x8x1xf32>
    %cst_33 = arith.constant dense<0.000000e+00> : vector<8x1xf32>
    %58 = vector.multi_reduction <add>, %57, %cst_33 [0] : vector<2x8x1xf32> to vector<8x1xf32>
    %59 = vector.shape_cast %58 : vector<8x1xf32> to vector<1x8x1xf32>
    %cst_34 = arith.constant 6.400000e+01 : f32
    %60 = vector.broadcast %cst_34 : f32 to vector<1x8x1xf32>
    %61 = arith.divf %59, %60 : vector<1x8x1xf32>
    %cst_35 = arith.constant 9.99999974E-6 : f32
    %62 = vector.broadcast %cst_35 : f32 to vector<1x8x1xf32>
    %63 = arith.addf %61, %62 : vector<1x8x1xf32>
    %64 = math.rsqrt %63 : vector<1x8x1xf32>
    %65 = vector.broadcast %64 : vector<1x8x1xf32> to vector<2x8x32xf32>
    %66 = arith.mulf %54, %65 : vector<2x8x32xf32>
    %c0_36 = arith.constant 0 : index
    %c0_37 = arith.constant 0 : index
    %c0_38 = arith.constant 0 : index
    %67 = vector.load %arg5[%c0_36, %c0_37, %c0_38] : memref<1x8x1xf32, #tpu.memory_space<vmem>>, vector<1x8x1xf32>
    %68 = vector.broadcast %67 : vector<1x8x1xf32> to vector<2x8x32xf32>
    %69 = arith.mulf %66, %68 : vector<2x8x32xf32>
    %c0_39 = arith.constant 0 : index
    %c0_40 = arith.constant 0 : index
    %c0_41 = arith.constant 0 : index
    %70 = vector.load %arg6[%c0_39, %c0_40, %c0_41] : memref<1x8x1xf32, #tpu.memory_space<vmem>>, vector<1x8x1xf32>
    %71 = vector.broadcast %70 : vector<1x8x1xf32> to vector<2x8x32xf32>
    %72 = arith.addf %69, %71 : vector<2x8x32xf32>
    %73 = vector.shape_cast %72 : vector<2x8x32xf32> to vector<16x32xf32>
    %c0_42 = arith.constant 0 : index
    %c0_43 = arith.constant 0 : index
    %74 = vector.load %arg11[%c0_42, %c0_43] : memref<32x32xf32, #tpu.memory_space<vmem>>, vector<32x32xf32>
    %cst_44 = arith.constant dense<0.000000e+00> : vector<16x32xf32>
    %75 = tpu.matmul %73, %74, %cst_44 {dimension_numbers = #tpu.dot_dimension_numbers<[1], [0], [0], [1], [0, 0, 1, 1], [], []>} : vector<16x32xf32>, vector<32x32xf32>, vector<16x32xf32> -> vector<16x32xf32>
    %c0_45 = arith.constant 0 : index
    %c0_46 = arith.constant 0 : index
    %76 = vector.load %arg12[%c0_45, %c0_46] : memref<1x32xf32, #tpu.memory_space<vmem>>, vector<1x32xf32>
    %77 = vector.broadcast %76 : vector<1x32xf32> to vector<16x32xf32>
    %78 = arith.addf %75, %77 : vector<16x32xf32>
    %79 = vector.shape_cast %78 : vector<16x32xf32> to vector<2x8x32xf32>
    %c0_47 = arith.constant 0 : index
    %c0_48 = arith.constant 0 : index
    %c0_49 = arith.constant 0 : index
    %80 = vector.load %arg13[%c0_47, %c0_48, %c0_49] : memref<2x8x32xf32, #tpu.memory_space<vmem>>, vector<2x8x32xf32>
    tpu.vector_store %arg13[%c0_47, %c0_48, %c0_49], %79 {strides = array<i32>} : memref<2x8x32xf32, #tpu.memory_space<vmem>>, vector<2x8x32xf32>,
    return
  }
  func.func @transform_0(%arg0: i32) -> (i32, i32, i32) {
    %c0_i32 = arith.constant 0 : i32
    %c0_i32_0 = arith.constant 0 : i32
    %c0_i32_1 = arith.constant 0 : i32
    return %c0_i32, %arg0, %c0_i32_0 : i32, i32, i32
  }
  func.func @transform_1(%arg0: i32) -> (i32, i32, i32) {
    %c0_i32 = arith.constant 0 : i32
    %c0_i32_0 = arith.constant 0 : i32
    %c0_i32_1 = arith.constant 0 : i32
    return %c0_i32, %arg0, %c0_i32_0 : i32, i32, i32
  }
  func.func @transform_2(%arg0: i32) -> (i32, i32, i32) {
    %c0_i32 = arith.constant 0 : i32
    %c0_i32_0 = arith.constant 0 : i32
    %c0_i32_1 = arith.constant 0 : i32
    return %c0_i32, %arg0, %c0_i32_0 : i32, i32, i32
  }
  func.func @transform_3(%arg0: i32) -> (i32, i32, i32) {
    %c0_i32 = arith.constant 0 : i32
    %c0_i32_0 = arith.constant 0 : i32
    %c0_i32_1 = arith.constant 0 : i32
    return %c0_i32, %arg0, %c0_i32_0 : i32, i32, i32
  }
  func.func @transform_4(%arg0: i32) -> (i32, i32, i32) {
    %c0_i32 = arith.constant 0 : i32
    %c0_i32_0 = arith.constant 0 : i32
    %c0_i32_1 = arith.constant 0 : i32
    return %c0_i32, %arg0, %c0_i32_0 : i32, i32, i32
  }
  func.func @transform_5(%arg0: i32) -> (i32, i32, i32) {
    %c0_i32 = arith.constant 0 : i32
    %c0_i32_0 = arith.constant 0 : i32
    %c0_i32_1 = arith.constant 0 : i32
    return %c0_i32, %arg0, %c0_i32_0 : i32, i32, i32
  }
  func.func @transform_6(%arg0: i32) -> (i32, i32) {
    %c0_i32 = arith.constant 0 : i32
    %c0_i32_0 = arith.constant 0 : i32
    %c0_i32_1 = arith.constant 0 : i32
    return %c0_i32, %c0_i32_0 : i32, i32
  }
  func.func @transform_7(%arg0: i32) -> (i32, i32) {
    %c0_i32 = arith.constant 0 : i32
    %c0_i32_0 = arith.constant 0 : i32
    %c0_i32_1 = arith.constant 0 : i32
    return %c0_i32, %c0_i32_0 : i32, i32
  }
  func.func @transform_8(%arg0: i32) -> (i32, i32) {
    %c0_i32 = arith.constant 0 : i32
    %c0_i32_0 = arith.constant 0 : i32
    %c0_i32_1 = arith.constant 0 : i32
    return %c0_i32, %c0_i32_0 : i32, i32
  }
  func.func @transform_9(%arg0: i32) -> (i32, i32) {
    %c0_i32 = arith.constant 0 : i32
    %c0_i32_0 = arith.constant 0 : i32
    %c0_i32_1 = arith.constant 0 : i32
    return %c0_i32, %c0_i32_0 : i32, i32
  }
  func.func @transform_10(%arg0: i32) -> (i32, i32) {
    %c0_i32 = arith.constant 0 : i32
    %c0_i32_0 = arith.constant 0 : i32
    %c0_i32_1 = arith.constant 0 : i32
    return %c0_i32, %c0_i32_0 : i32, i32
  }
  func.func @transform_11(%arg0: i32) -> (i32, i32) {
    %c0_i32 = arith.constant 0 : i32
    %c0_i32_0 = arith.constant 0 : i32
    %c0_i32_1 = arith.constant 0 : i32
    return %c0_i32, %c0_i32_0 : i32, i32
  }
  func.func @transform_12(%arg0: i32) -> (i32, i32, i32) {
    %c0_i32 = arith.constant 0 : i32
    %c0_i32_0 = arith.constant 0 : i32
    %c0_i32_1 = arith.constant 0 : i32
    return %c0_i32, %arg0, %c0_i32_0 : i32, i32, i32
  }
}

</mosaic_0001>

<bundles_post_ra>
// kernel: encoder_module_forward.3
= control target key start
LH: loop header
LB: loop body
LE: loop exit
PB: predicated region body
PF: predicated region fallthrough
CT: control target
= control target key end

     0   :  { %vm48_vm0 = vcmask 261120   ;;  %s814_s0 = inlined_call_operand.vmem [shape: f32[2,8,32], index: 0, kind: input, shape index: {}]   ;;  %s815_s1 = inlined_call_operand.vmem [shape: f32[2,8,32], index: 1, kind: input, shape index: {}]   ;;  %s816_s2 = inlined_call_operand.vmem [shape: f32[1,8,1], index: 2, kind: input, shape index: {}]   ;;  %s817_s3 = inlined_call_operand.vmem [shape: f32[1,8,1], index: 3, kind: input, shape index: {}]   ;;  %s818_s4 = inlined_call_operand.vmem [shape: f32[1,8,1], index: 4, kind: input, shape index: {}]   ;;  %s819_s5 = inlined_call_operand.vmem [shape: f32[1,8,1], index: 5, kind: input, shape index: {}]   ;;  %s820_s6 = inlined_call_operand.vmem [shape: f32[32,128], index: 6, kind: input, shape index: {}]   ;;  %s821_s7 = inlined_call_operand.vmem [shape: f32[1,128], index: 7, kind: input, shape index: {}]   ;;  %s822_s8 = inlined_call_operand.vmem [shape: f32[128,32], index: 8, kind: input, shape index: {}]   ;;  %s823_s9 = inlined_call_operand.vmem [shape: f32[1,32], index: 9, kind: input, shape index: {}]   ;;  %s824_s10 = inlined_call_operand.vmem [shape: f32[32,32], index: 10, kind: input, shape index: {}]   ;;  %s825_s11 = inlined_call_operand.vmem [shape: f32[1,32], index: 11, kind: input, shape index: {}]   ;;  %s826_s12 = inlined_call_operand.hbm [shape: f32[2,8,32], index: 12, kind: output, shape index: {}]  }
   0x1   :  { %v42_v0 = vld [vmem:[%s814_s0] sm:$0xff]  ;;  %v43_v2 = vld [vmem:[%s814_s0 + $0x8] sm:$0xff] }
   0x2   :  { %v44_v1 = vld [vmem:[%s815_s1] sm:$0xff]  ;;  %v45_v4 = vld [vmem:[%s815_s1 + $0x8] sm:$0xff] }
   0x3   :  { %v46_v3 = vadd.f32 %v44_v1, %v42_v0 }
   0x4   :  { %17 = vsyncpa [#allocation3], 0  ;;  %v47_v5 = vadd.f32 %v45_v4, %v43_v2  ;;  %v74_v8 = vld [vmem:[%s816_s2] sm:$0xff]  ;;  %v614_v9 = vmov 0   ;;  %v91_v22 = vld [vmem:[%s820_s6 + $0x8] sm:$0xff]  ;;  %s615_s18 = smov [#allocation2]  }
   0x5   :  { %v49_v6 = vsel %vm48_vm0, %v46_v3, 0.0  ;;  %584 = vset.pattern.permute.xlu0 %v614_v9  ;;  %585 = vset.pattern.permute.xlu1 %v614_v9  ;;  %v82_v20 = vld [vmem:[%s817_s3] sm:$0xff]  ;;  %v92_v24 = vld [vmem:[%s820_s6 + $0x10] sm:$0xff]  ;;  %v93_v25 = vld [vmem:[%s820_s6 + $0x18] sm:$0xff]  ;;  %s427_s19 = sshll.u32 %s615_s18, 4  ;;  %s428_s19 = int_to_ptr.vmem [resolvable:$true] %s427_s19 }
   0x6   :  { %50 = vadd.xlane.f32.xlu0 %v49_v6  ;;  %v52_v7 = vsel %vm48_vm0, %v47_v5, 0.0  ;;  %v90_v21 = vld [vmem:[%s820_s6] sm:$0xff]  ;;  %v536_v26 = vpack.c.bf16 %v93_v25, %v92_v24  ;;  %v189_v28 = vld [vmem:[%s822_s8 + $0x8] sm:$0xff]  ;;  %v190_v29 = vld [vmem:[%s822_s8 + $0x10] sm:$0xff]  ;;  %s590_s3 = scalar_lea.vmem %s428_s19, 256  ;;  %p595_p1 = scmp.lt.s32.totalorder %s428_s19, %s428_s19 }
   0x7   :  { %v532_v23 = vpack.c.bf16 %v91_v22, %v90_v21  ;;  %v188_v27 = vld [vmem:[%s822_s8] sm:$0xff]  ;;  %v191_v31 = vld [vmem:[%s822_s8 + $0x18] sm:$0xff]  ;;  %v193_v34 = vld [vmem:[%s822_s8 + $0x28] sm:$0xff]  ;;  %p591_p0 = scmp.ne.s32.totalorder %s428_s19, %s590_s3  ;;  %p596_p2 = scmp.lt.s32.totalorder %s590_s3, %s590_s3 }
   0x8   :  { %v540_v30 = vpack.c.bf16 %v189_v28, %v188_v27  ;;  %v544_v32 = vpack.c.bf16 %v191_v31, %v190_v29  ;;  %v192_v33 = vld [vmem:[%s822_s8 + $0x20] sm:$0xff]  ;;  %v194_v36 = vld [vmem:[%s822_s8 + $0x30] sm:$0xff]  ;;  %v195_v37 = vld [vmem:[%s822_s8 + $0x38] sm:$0xff] }
   0x9   :  { %533 = vmatprep.subr.bf16.mxu0 %v532_v23  ;;  %v548_v35 = vpack.c.bf16 %v193_v34, %v192_v33  ;;  %v552_v38 = vpack.c.bf16 %v195_v37, %v194_v36  ;;  %v196_v39 = vld [vmem:[%s822_s8 + $0x40] sm:$0xff]  ;;  %v197_v40 = vld [vmem:[%s822_s8 + $0x48] sm:$0xff]  ;;  %v198_v42 = vld [vmem:[%s822_s8 + $0x50] sm:$0xff]  ;;  %p597_p3 = por %p596_p2, %p595_p1 }
   0xa   :  { %53 = vadd.xlane.f32.xlu0 %v52_v7  ;;  %535 = vmatpush3.bf16.msra.mxu0 %v532_v23  ;;  %v556_v41 = vpack.c.bf16 %v197_v40, %v196_v39  ;;  %v199_v43 = vld [vmem:[%s822_s8 + $0x58] sm:$0xff]  ;;  %v200_v59 = vld [vmem:[%s822_s8 + $0x60] sm:$0xff]  ;;  %v201_v60 = vld [vmem:[%s822_s8 + $0x68] sm:$0xff] }
   0xb   :  { %537 = vmatprep.subr.bf16.mxu0 %v536_v26  ;;  %541 = vmatprep.subr.bf16.mxu1 %v540_v30  ;;  %v560_v44 = vpack.c.bf16 %v199_v43, %v198_v42  ;;  %v564_v61 = vpack.c.bf16 %v201_v60, %v200_v59  ;;  %v202_v62 = vld [vmem:[%s822_s8 + $0x70] sm:$0xff]  ;;  %v203_v63 = vld [vmem:[%s822_s8 + $0x78] sm:$0xff]  ;;  %v438_v1 = vld [vmem:[%s821_s7] ss:$0 sm:$0xff]  ;;  %p598_p4 = pnand %p597_p3, %p591_p0 }
   0xc   :  { %543 = vmatpush3.bf16.msra.mxu1 %v540_v30  ;;  %v568_v0 = vpack.c.bf16 %v203_v63, %v202_v62  ;;  %v312_v30 = vld [vmem:[%s818_s4] sm:$0xff]  ;;  %v330_v34 = vld [vmem:[%s824_s10 + $0x10] sm:$0xff] }
   0xd   :  { %545 = vmatprep.subr.bf16.mxu1 %v544_v32  ;;  %v328_v31 = vld [vmem:[%s824_s10] sm:$0xff] }
   0xe   :  { %539 = vmatpush3.bf16.msra.mxu0 %v536_v26 }
  0x10   :  { %547 = vmatpush3.bf16.msra.mxu1 %v544_v32  ;;  %v329_v32 = vld [vmem:[%s824_s10 + $0x8] sm:$0xff] }
  0x11   :  { %549 = vmatprep.subr.bf16.mxu1 %v548_v35  ;;  %v572_v33 = vpack.c.bf16 %v329_v32, %v328_v31 }
  0x13   :  { %573 = vmatprep.subr.bf16.mxu0 %v572_v33 }
  0x14   :  { %551 = vmatpush3.bf16.msra.mxu1 %v548_v35  ;;  %v331_v35 = vld [vmem:[%s824_s10 + $0x18] sm:$0xff] }
  0x15   :  { %553 = vmatprep.subr.bf16.mxu1 %v552_v38  ;;  %v576_v36 = vpack.c.bf16 %v331_v35, %v330_v34 }
  0x18   :  { %555 = vmatpush3.bf16.msra.mxu1 %v552_v38 }
  0x19   :  { %557 = vmatprep.subr.bf16.mxu1 %v556_v41 }
  0x1c   :  { %559 = vmatpush3.bf16.msra.mxu1 %v556_v41 }
  0x1d   :  { %561 = vmatprep.subr.bf16.mxu1 %v560_v44 }
  0x20   :  { %77 = vperm.xlu0 %584, %v74_v8   ;;  %563 = vmatpush3.bf16.msra.mxu1 %v560_v44 }
  0x21   :  { %565 = vmatprep.subr.bf16.mxu1 %v564_v61 }
  0x24   :  { %567 = vmatpush3.bf16.msra.mxu1 %v564_v61 }
  0x25   :  { %569 = vmatprep.subr.bf16.mxu1 %v568_v0 }
  0x28   :  { %571 = vmatpush3.bf16.msra.mxu1 %v568_v0 }
  0x93   :  { %v51_v10 = vpop.xlane.xlu0 %50 }
  0x97   :  { %v54_v11 = vpop.xlane.xlu0 %53 }
  0x98   :  { %v55_v12 = vadd.f32 %v54_v11, %v51_v10  ;;  %v441_v10 = vld [vmem:[%s823_s9] ss:$0 sm:$0xff] }
  0x9a   :  { %v57_v13 = vmul.f32 0.015625, %v55_v12 }
  0x9c   :  { %v58_v14 = vsub.f32 %v46_v3, %v57_v13  ;;  %v59_v15 = vsub.f32 %v47_v5, %v57_v13 }
  0x9e   :  { %v60_v16 = vmul.f32 %v58_v14, %v58_v14  ;;  %v61_v18 = vmul.f32 %v59_v15, %v59_v15 }
  0x9f   :  { %v78_v51 = vpop.permute.xlu0 %77 }
  0xa0   :  { %v62_v17 = vsel %vm48_vm0, %v60_v16, 0.0  ;;  %v65_v19 = vsel %vm48_vm0, %v61_v18, 0.0 }
  0xa1   :  { %63 = vadd.xlane.f32.xlu1 %v62_v17 }
  0xa5   :  { %66 = vadd.xlane.f32.xlu1 %v65_v19  ;;  %v320_v19 = vld [vmem:[%s819_s5] sm:$0xff] }
  0xb6   :  { %85 = vperm.xlu1 %585, %v82_v20  }
 0x12e   :  { %v64_v45 = vpop.xlane.xlu1 %63 }
 0x132   :  { %v67_v46 = vpop.xlane.xlu1 %66 }
 0x133   :  { %v68_v47 = vadd.f32 %v67_v46, %v64_v45 }
 0x135   :  { %v69_v48 = vmul.f32 0.015625, %v68_v47 }
 0x136   :  { %v86_v54 = vpop.permute.xlu1 %85 }
 0x137   :  { %v70_v49 = vadd.f32 1e-05, %v69_v48 }
 0x139   :  { %586 = vrsqrt.f32 %v70_v49 }
 0x143   :  { %v587_v50 = vpop.eup %586 }
 0x144   :  { %v72_v52 = vmul.f32 %v587_v50, %v58_v14  ;;  %v73_v53 = vmul.f32 %v587_v50, %v59_v15 }
 0x146   :  { %v80_v55 = vmul.f32 %v78_v51, %v72_v52  ;;  %v81_v56 = vmul.f32 %v78_v51, %v73_v53  ;;  %v442_v51 = vld [vmem:[%s825_s11] ss:$0 sm:$0xff] }
 0x148   :  { %v89_v57 = vadd.f32 %v86_v54, %v81_v56  ;;  %v88_v58 = vadd.f32 %v86_v54, %v80_v55 }
 0x14a   :  { %483 = vmatprep.mubr.msk.f32.mxu0 %vm48_vm0, %v88_v58 }
 0x14b   :  { %484 = vmatmul.mubr.msk.f32.vlgmr.msra.gmra.mrb[0].mxu0 %vm48_vm0, %v89_v57 }
 0x14c   :  { %575 = vmatpush3.bf16.msra.mxu0 %v572_v33 }
 0x14d   :  { %577 = vmatprep.subr.bf16.mxu0 %v576_v36 }
 0x150   :  { %579 = vmatpush3.bf16.msra.mxu0 %v576_v36 }
 0x21e   :  { %v485_v2 = vpop.f32.mrb[0].mxu0 }
 0x21f   :  { %v179_v3 = vadd.f32 %v485_v2, %v438_v1  ;;  %v173_v4 = vpop.f32.mrb[1].mxu0 }
 0x220   :  { %v174_v5 = vadd.f32 %v438_v1, %v173_v4 }
 0x221   :  { %v185_v6 = vmul.f32 0.01, %v179_v3  ;;  %vm183_vm2 = vcmp.ge.f32.partialorder %v179_v3, 0.0 }
 0x222   :  { %vm182_vm1 = vcmp.ge.f32.partialorder %v174_v5, 0.0  ;;  %v184_v7 = vmul.f32 0.01, %v174_v5 }
 0x223   :  { %v187_v9 = vsel %vm183_vm2, %v179_v3, %v185_v6 }
 0x224   :  { %v186_v8 = vsel %vm182_vm1, %v174_v5, %v184_v7 }
 0x225   :  { %518 = vmatprep.mubr.f32.mxu1 %v186_v8 }
 0x226   :  { %519 = vmatmul.mubr.f32.vlgmr.msra.gmra.mrb[0].mxu1 %v187_v9 }
 0x2f9   :  { %v520_v11 = vpop.f32.mrb[0].mxu1 }
 0x2fa   :  { %v283_v12 = vadd.f32 %v520_v11, %v441_v10  ;;  %v277_v13 = vpop.f32.mrb[1].mxu1 }
 0x2fb   :  { %v278_v14 = vadd.f32 %v441_v10, %v277_v13 }
 0x2fc   :  { %v287_v15 = vadd.f32 %v283_v12, %v89_v57 }
 0x2fd   :  { %v286_v16 = vadd.f32 %v278_v14, %v88_v58 }
 0x2fe   :  { %v291_v17 = vsel %vm48_vm0, %v287_v15, 0.0 }
 0x2ff   :  { %292 = vadd.xlane.f32.xlu0 %v291_v17  ;;  %v288_v18 = vsel %vm48_vm0, %v286_v16, 0.0 }
 0x300   :  { %289 = vadd.xlane.f32.xlu1 %v288_v18 }
 0x315   :  { %323 = vperm.xlu0 %584, %v320_v19  }
 0x38c   :  { %v293_v20 = vpop.xlane.xlu0 %292 }
 0x38d   :  { %v290_v21 = vpop.xlane.xlu1 %289 }
 0x38e   :  { %v294_v22 = vadd.f32 %v293_v20, %v290_v21 }
 0x390   :  { %v295_v23 = vmul.f32 0.015625, %v294_v22 }
 0x392   :  { %v296_v24 = vsub.f32 %v286_v16, %v295_v23  ;;  %v297_v25 = vsub.f32 %v287_v15, %v295_v23 }
 0x394   :  { %v298_v26 = vmul.f32 %v296_v24, %v296_v24  ;;  %v299_v28 = vmul.f32 %v297_v25, %v297_v25  ;;  %v324_v48 = vpop.permute.xlu0 %323 }
 0x396   :  { %v300_v27 = vsel %vm48_vm0, %v298_v26, 0.0  ;;  %v303_v29 = vsel %vm48_vm0, %v299_v28, 0.0 }
 0x397   :  { %301 = vadd.xlane.f32.xlu1 %v300_v27 }
 0x39b   :  { %304 = vadd.xlane.f32.xlu1 %v303_v29 }
 0x3ac   :  { %315 = vperm.xlu1 %585, %v312_v30  }
 0x424   :  { %v302_v37 = vpop.xlane.xlu1 %301 }
 0x428   :  { %v305_v38 = vpop.xlane.xlu1 %304 }
 0x429   :  { %v306_v39 = vadd.f32 %v305_v38, %v302_v37 }
 0x42b   :  { %v307_v40 = vmul.f32 0.015625, %v306_v39 }
 0x42c   :  { %v316_v45 = vpop.permute.xlu1 %315 }
 0x42d   :  { %v308_v41 = vadd.f32 1e-05, %v307_v40 }
 0x42f   :  { %588 = vrsqrt.f32 %v308_v41 }
 0x439   :  { %v589_v42 = vpop.eup %588 }
 0x43a   :  { %v310_v43 = vmul.f32 %v589_v42, %v296_v24  ;;  %v311_v44 = vmul.f32 %v589_v42, %v297_v25 }
 0x43c   :  { %v318_v46 = vmul.f32 %v316_v45, %v310_v43  ;;  %v319_v47 = vmul.f32 %v316_v45, %v311_v44 }
 0x43e   :  { %v326_v49 = vadd.f32 %v324_v48, %v318_v46  ;;  %v327_v50 = vadd.f32 %v324_v48, %v319_v47 }
 0x440   :  { %529 = vmatprep.mubr.msk.f32.mxu0 %vm48_vm0, %v326_v49 }
 0x441   :  { %530 = vmatmul.mubr.msk.f32.vlgmr.msra.gmra.mrb[2].mxu0 %vm48_vm0, %v327_v50 }
 0x514   :  { %v531_v52 = vpop.f32.mrb[2].mxu0 }
 0x515   :  { %v417_v53 = vadd.f32 %v531_v52, %v442_v51  ;;  %v411_v54 = vpop.f32.mrb[3].mxu0 }
 0x516   :  { %v412_v55 = vadd.f32 %v442_v51, %v411_v54 }
 0x517   :  { %421 = vst.msk [vmem:[#allocation2 + $0x8] sm:$0xff] %vm48_vm0, %v417_v53 }
 0x518   :  { %420 = vst.msk [vmem:[#allocation2] sm:$0xff] %vm48_vm0, %v412_v55 }
 0x519   :  { %601 = shalt.err (!%p598_p4)
}
 0x51a   :  { %s602_s21 = scalar_lea.hbm %s826_s12, 256 }
 0x51b   :  { %p603_p5 = scmp.ne.s32.totalorder %s826_s12, %s602_s21  ;;  %p606_p6 = scmp.lt.u32.totalorder %s602_s21, %s826_s12 }
 0x51d   :  { %p608_p7 = pnand %p606_p6, %p603_p5 }
 0x51f   :  { %611 = shalt.err (!%p608_p7)
}
 0x520   :  { %s616_s26 = smov 128   ;;  %s617_s6 = smov 8  }
 0x521   :  { %433 = dma.vmem_to_hbm [thread:$0]  %s428_s19, 256, %s826_s12, [#allocation3], %s616_s26, %s616_s26, %s617_s6  }
 0x522   :  { %612 = dma.done.wait [#allocation3], 256  }
 0x523   :  { %613 = vsyncadd [#allocation3], 4294967040 }
 0x524   :  { %437 = vsyncpa [#allocation3], 1 }

// kernel: encoder_module_forward.2
= control target key start
LH: loop header
LB: loop body
LE: loop exit
PB: predicated region body
PF: predicated region fallthrough
CT: control target
= control target key end

     0   :  { %s2250_s13 = smov 0   ;;  %s2252_s14 = smov 0   ;;  %s2585_s0 = inlined_call_operand.vmem [shape: f32[2,8,32], index: 0, kind: input, shape index: {}]   ;;  %s2586_s1 = inlined_call_operand.vmem [shape: f32[32,32], index: 1, kind: input, shape index: {}]   ;;  %s2587_s2 = inlined_call_operand.vmem [shape: f32[1,32], index: 2, kind: input, shape index: {}]   ;;  %s2588_s3 = inlined_call_operand.vmem [shape: f32[32,32], index: 3, kind: input, shape index: {}]   ;;  %s2589_s4 = inlined_call_operand.vmem [shape: f32[1,32], index: 4, kind: input, shape index: {}]   ;;  %s2590_s5 = inlined_call_operand.vmem [shape: f32[32,32], index: 5, kind: input, shape index: {}]   ;;  %s2591_s6 = inlined_call_operand.vmem [shape: f32[1,32], index: 6, kind: input, shape index: {}]   ;;  %s2592_s7 = inlined_call_operand.vmem [shape: f32[8,8], index: 7, kind: input, shape index: {}]   ;;  %s2593_s8 = inlined_call_operand.vmem [shape: f32[32,32], index: 8, kind: input, shape index: {}]   ;;  %s2594_s9 = inlined_call_operand.vmem [shape: f32[1,32], index: 9, kind: input, shape index: {}]   ;;  %s2595_s10 = inlined_call_operand.vmem [shape: f32[2,8,32], index: 10, kind: output, shape index: {}]  }
   0x1   :  { %s2254_s15 = smov 0  }
   0x2 LB: > { %s32_s16 = sadd.s32 1, %s2174_s14  ;;  %p1896_p0 = scmp.ge.s32.totalorder %s2178_s15, 1  ;;  %s2178_s15 = sphi %s2254_s15, %s20_s15   ;;  %s2174_s14 = sphi %s2252_s14, %s2603_s14   ;;  %s2170_s13 = sphi %s2250_s13, %s2602_s13  }
   0x3   : > { %p34_p1 = scmp.ge.s32.totalorder %s32_s16, 2  ;;  %p325_p2 = scmp.lt.s32.totalorder %s2178_s15, 3 }
   0x5   : > { %s2605_s16 = smov (%p34_p1, %s32_s16), 0  ;;  %p326_p3 = pnand %p1896_p0, %p325_p2 }
   0x6   : > { %v464_v0 = vld [vmem:[%s2588_s3] sm:$0xff] (!%p326_p3)  ;;  %v465_v1 = vld [vmem:[%s2588_s3 + $0x8] sm:$0xff] (!%p326_p3)  ;;  %v2180_v3 = vmov (!%p326_p3), 0.0|0.0   ;;  %v466_v6 = vld [vmem:[%s2588_s3 + $0x10] sm:$0xff] (!%p326_p3)  ;;  %p364_p4 = scmp.lt.s32.totalorder (!%p326_p3), %s2170_s13, 1  ;;  %vm2181_vm0 = vmmov (!%p326_p3), 0   ;;  %v629_v24 = vlaneseq (!%p326_p3) }
   0x7   : > { %329 = sbr.rel (%p326_p3) target bundleno = 3088 (0xc10), region = 60  ;;  %v379_v2 = vld [vmem:[%s2586_s1] sm:$0xff] (!%p326_p3)  ;;  %2083 = vmatprep.subr.bf16.mxu1 (!%p326_p3), %v2180_v3  ;;  %v2084_v4 = vpack.c.bf16 (!%p326_p3), %v465_v1, %v464_v0  ;;  %2077 = vmatprep.subr.bf16.mxu0 (!%p326_p3), %v2180_v3  ;;  %v380_v5 = vld [vmem:[%s2586_s1 + $0x8] sm:$0xff] (!%p326_p3)  ;;  %v467_v7 = vld [vmem:[%s2588_s3 + $0x18] sm:$0xff] (!%p326_p3)  ;;  %v2182_v11 = vmov (!%p326_p3), 0.0   ;;  %vm390_vm1 = vcmask (!%p326_p3), 261120  }
   0x8   : > { %v2078_v8 = vpack.c.bf16 (!%p326_p3), %v380_v5, %v379_v2  ;;  %v381_v9 = vld [vmem:[%s2586_s1 + $0x10] sm:$0xff] (!%p326_p3)  ;;  %v382_v10 = vld [vmem:[%s2586_s1 + $0x18] sm:$0xff] (!%p326_p3)  ;;  %1992 = vmatprep.mubr.msk.f32.mxu1 (!%p326_p3), %vm2181_vm0, %v2182_v11  ;;  %1981 = vmatprep.mubr.msk.f32.mxu0 (!%p326_p3), %vm2181_vm0, %v2182_v11  ;;  %v2087_v12 = vpack.c.bf16 (!%p326_p3), %v467_v7, %v466_v6  ;;  %v1901_v15 = vld [vmem:[%s2589_s4] ss:$0 sm:$0xff] (!%p326_p3)  ;;  %vm645_vm2 = vcmask (!%p326_p3), 64512   ;;  %v2349_v25 = vshrl.u32 (!%p326_p3), %v629_v24, 7 }
   0x9   : > { %2085 = vmatpush3.bf16.msra.mxu1 (!%p326_p3), %v2084_v4  ;;  %v2081_v13 = vpack.c.bf16 (!%p326_p3), %v382_v10, %v381_v9  ;;  %v1899_v16 = vld [vmem:[%s2587_s2] ss:$0 sm:$0xff] (!%p326_p3)  ;;  %v2351_v26 = vand.u32 (!%p326_p3), 127, %v629_v24  ;;  %v549_v28 = vld [vmem:[%s2590_s5 + $0x8] sm:$0xff] (!%p326_p3)  ;;  %s2183_s11 = smov (!%p326_p3), 127   ;;  %s2184_s12 = smov (!%p326_p3), 7  }
   0xa   : > { %2079 = vmatpush3.bf16.msra.mxu0 (!%p326_p3), %v2078_v8  ;;  %2086 = vmatprep.subr.bf16.mxu1 (!%p326_p3), %v2180_v3  ;;  %v2336_v23 = vld [vmem:[%s2592_s7] sm:$0xff] (!%p326_p3)  ;;  %v550_v36 = vld [vmem:[%s2590_s5 + $0x10] sm:$0xff] (!%p326_p3)  ;;  %v551_v37 = vld [vmem:[%s2590_s5 + $0x18] sm:$0xff] (!%p326_p3)  ;;  %v637_v39 = vsub.s32 (!%p326_p3), 7, %v2349_v25  ;;  %vm814_vm4 = vcmask (!%p326_p3), 56320   ;;  %s2185_s22 = smov (!%p326_p3), 6  }
   0xb   : > { %2080 = vmatprep.subr.bf16.mxu0 (!%p326_p3), %v2180_v3  ;;  %vm635_vm3 = vcmp.gt.s32.totalorder (!%p326_p3), %v2351_v26, %v2349_v25  ;;  %v548_v27 = vld [vmem:[%s2590_s5] sm:$0xff] (!%p326_p3)  ;;  %v2093_v38 = vpack.c.bf16 (!%p326_p3), %v551_v37, %v550_v36  ;;  %s2186_s23 = smov (!%p326_p3), 126   ;;  %vm826_vm6 = vcmask (!%p326_p3), 48128   ;;  %s2187_s26 = smov (!%p326_p3), 124   ;;  %vm838_vm8 = vcmask (!%p326_p3), 31744  }
   0xc   : > { %v2090_v29 = vpack.c.bf16 (!%p326_p3), %v549_v28, %v548_v27  ;;  %v638_v40 = vand.u32 (!%p326_p3), 1, %v637_v39  ;;  %v1903_v51 = vld [vmem:[%s2591_s6] ss:$0 sm:$0xff] (!%p326_p3)  ;;  %v640_v55 = vand.u32 (!%p326_p3), 2, %v637_v39  ;;  %s2188_s27 = smov (!%p326_p3), 4   ;;  %s2189_s28 = smov (!%p326_p3), 120   ;;  %vm636_vm10 = vcmp.le.s32.totalorder (!%p326_p3), %v2351_v26, %v2349_v25 }
   0xd   : > { %2088 = vmatpush3.bf16.msra.mxu1 (!%p326_p3), %v2087_v12  ;;  %v642_v62 = vand.u32 (!%p326_p3), 4, %v637_v39  ;;  %s2190_s29 = smov (!%p326_p3), 112   ;;  %s2191_s30 = smov (!%p326_p3), 104   ;;  %vm1189_vm11 = vcmask (!%p326_p3), 130112   ;;  %vm1460_vm12 = vcmask (!%p326_p3), 195712   ;;  %v1734_v1 = vld [vmem:[%s2593_s8] sm:$0xff] (!%p326_p3) }
   0xe   : > { %s2607_s13 = smov (!%p364_p4, %s2170_s13), 1  ;;  %2082 = vmatpush3.bf16.msra.mxu0 %v2081_v13  ;;  %2006 = vmatprep.subr.mxu1 %v2182_v11  ;;  %vm2382_vm5 = vcmp.ne.s32.totalorder %v638_v40, 0  ;;  %vm2399_vm7 = vcmp.ne.s32.totalorder %v640_v55, 0  ;;  %v1735_v25 = vld [vmem:[%s2593_s8 + $0x8] sm:$0xff]  ;;  %vm1731_vm13 = vcmask 261312  }
   0xf   : > { %s1897_s17 = sshll.u32 %s2607_s13, 3  ;;  %2089 = vmatprep.subr.bf16.mxu0 %v2180_v3  ;;  %vm2412_vm9 = vcmp.ne.s32.totalorder %v642_v62, 0  ;;  %v2096_v26 = vpack.c.bf16 %v1735_v25, %v1734_v1 }
  0x10   : > { %s367_s20 = scalar_lea.vmem %s2585_s0, %s1897_s17 }
  0x11   : > { %v376_v14 = vld [vmem:[%s367_s20] sm:$0xff] }
  0x12   : > { %1993 = vmatmul.mubr.msk.f32.vlgmr.msra.gmra.mrb[0].mxu1 %vm390_vm1, %v376_v14  ;;  %1982 = vmatmul.mubr.msk.f32.vlgmr.msra.gmra.mrb[0].mxu0 %vm390_vm1, %v376_v14 }
  0x13   : > { %2008 = vmatprep.mubr.msk.f32.mxu1 %vm2181_vm0, %v2182_v11  ;;  %2003 = vmatprep.mubr.msk.f32.mxu0 %vm2181_vm0, %v2182_v11 }
  0x14   : > { %2091 = vmatpush3.bf16.msra.mxu0 %v2090_v29 }
  0x15   : > { %2092 = vmatprep.subr.bf16.mxu0 %v2180_v3 }
  0x18   : > { %2094 = vmatpush3.bf16.msra.mxu0 %v2093_v38 }
  0x19   : > { %2026 = vmatprep.subr.mxu0 %v2182_v11 }
  0x1b   : > { %2004 = vmatmul.mubr.msk.f32.vlgmr.msra.gmra.mrb[2].mxu0 %vm390_vm1, %v376_v14 }
  0x1c   : > { %2028 = vmatprep.mubr.msk.f32.mxu0 %vm2181_vm0, %v2182_v11 }
  0x21   : > { %2027 = vmatpush3.xpose.msk.msra.mxu0 %vm645_vm2, %v2336_v23 }
  0x22   : > { %2036 = vmatprep.subr.mxu0 %v2182_v11 }
  0xe5   : > { %v544_v17 = vpop.f32.mrb[0].mxu1  ;;  %v460_v20 = vpop.f32.mrb[0].mxu0 }
  0xe6   : > { %v2326_v18 = vadd.f32 %v1901_v15, %v544_v17  ;;  %v1994_v19 = vpop.f32.mrb[1].mxu1  ;;  %v2328_v21 = vadd.f32 %v1899_v16, %v460_v20  ;;  %v1983_v22 = vpop.f32.mrb[1].mxu0 }
  0xe8   : > { %2007 = vmatpush3.xpose.msk.msra.mxu1 %vm645_vm2, %v2326_v18 }
  0xe9   : > { %2011 = vmatprep.subr.mxu1 %v2182_v11 }
  0xeb   : > { %2009 = vmatmul.mubr.msk.f32.vlgmr.msra.gmra.mrb[2].mxu1 %vm645_vm2, %v2328_v21 }
  0xec   : > { %2012 = vmatpush3.xpose.msk.msra.mxu1 %vm645_vm2, %v2336_v23  ;;  %2013 = vmatprep.mubr.msk.f32.mxu1 %vm2181_vm0, %v2182_v11 }
  0xed   : > { %2016 = vmatprep.subr.mxu1 %v2182_v11 }
  0xee   : > { %v625_v52 = vpop.f32.mrb[2].mxu0 }
  0xef   : > { %2014 = vmatmul.mubr.msk.f32.vlgmr.msra.gmra.mrb[4].mxu1 %vm645_vm2, %v2328_v21  ;;  %v2395_v53 = vadd.f32 %v1903_v51, %v625_v52  ;;  %v2005_v54 = vpop.f32.mrb[3].mxu0 }
  0xf0   : > { %2018 = vmatprep.mubr.msk.f32.mxu1 %vm2181_vm0, %v2182_v11 }
  0xf1   : > { %2017 = vmatpush3.msra.mxu1 %v2395_v53 }
  0xf2   : > { %2021 = vmatprep.subr.mxu1 %v2182_v11 }
 0x1be   : > { %v718_v30 = vpop.f32.mrb[2].mxu1 }
 0x1bf   : > { %v722_v31 = vsel %vm635_vm3, %v718_v30, -1e+20  ;;  %v2010_v32 = vpop.f32.mrb[3].mxu1 }
 0x1c0   : > { %v723_v33 = vsel %vm645_vm2, %v722_v31, -inf }
 0x1c1   : > { %724 = vmax.xlane.f32.xlu1 %v723_v33 }
 0x1c2   : > { %v803_v34 = vpop.f32.mrb[4].mxu1 }
 0x1c3   : > { %808 = vrot.lane.b32.xlu0 %v803_v34, %s2183_s11  ;;  %v2015_v35 = vpop.f32.mrb[5].mxu1 }
 0x1c7   : > { %811 = vrot.lane.b32.xlu0 %v803_v34, %s2184_s12 }
 0x235   : > { %v809_v41 = vpop.permute.xlu0 %808 }
 0x239   : > { %v812_v43 = vpop.permute.xlu0 %811 }
 0x23a   : > { %v815_v44 = vsel %vm814_vm4, %v809_v41, %v812_v43 }
 0x23b   : > { %v818_v45 = vsel %vm2382_vm5, %v815_v44, %v803_v34 }
 0x23c   : > { %823 = vrot.lane.b32.xlu0 %v818_v45, %s2185_s22  ;;  %820 = vrot.lane.b32.xlu1 %v818_v45, %s2186_s23 }
 0x24e   : > { %v725_v46 = vpop.xlane.xlu1 %724 }
 0x24f   : > { %v726_v47 = vsub.f32 %v722_v31, %v725_v46 }
 0x251   : > { %v727_v48 = vmul.f32 1.442695, %v726_v47 }
 0x253   : > { %2140 = vpow2.f32 %v727_v48 }
 0x25d   : > { %v2141_v49 = vpop.eup %2140 }
 0x25e   : > { %v729_v50 = vsel %vm645_vm2, %v2141_v49, 0.0 }
 0x25f   : > { %730 = vadd.xlane.f32.xlu0 %v729_v50 }
 0x2ae   : > { %v824_v57 = vpop.permute.xlu0 %823  ;;  %v821_v58 = vpop.permute.xlu1 %820 }
 0x2af   : > { %v827_v59 = vsel %vm826_vm6, %v821_v58, %v824_v57 }
 0x2b0   : > { %v830_v60 = vsel %vm2399_vm7, %v827_v59, %v818_v45 }
 0x2b1   : > { %832 = vrot.lane.b32.xlu1 %v830_v60, %s2187_s26 }
 0x2b5   : > { %835 = vrot.lane.b32.xlu1 %v830_v60, %s2188_s27 }
 0x2b9   : > { %919 = vrot.lane.b32.xlu1 %v2328_v21, %s2189_s28 }
 0x2bd   : > { %921 = vrot.lane.b32.xlu1 %v2326_v18, %s2189_s28 }
 0x2ec   : > { %v731_v61 = vpop.xlane.xlu0 %730 }
 0x2ed   : > { %2142 = vrcp.f32 %v731_v61 }
 0x2f7   : > { %v2143_v0 = vpop.eup %2142 }
 0x2f8   : > { %v733_v5 = vmul.f32 %v2143_v0, %v2141_v49 }
 0x323   : > { %v833_v63 = vpop.permute.xlu1 %832 }
 0x327   : > { %v836_v2 = vpop.permute.xlu1 %835 }
 0x328   : > { %v839_v4 = vsel %vm838_vm8, %v833_v63, %v836_v2 }
 0x329   : > { %v842_v6 = vsel %vm2412_vm9, %v839_v4, %v830_v60 }
 0x32a   : > { %v843_v7 = vsel %vm636_vm10, %v842_v6, 0.0 }
 0x32b   : > { %v844_v8 = vadd.f32 %v843_v7, %v733_v5  ;;  %v920_v9 = vpop.permute.xlu1 %919 }
 0x32c   : > { %2029 = vmatmul.mubr.msk.f32.vlgmr.msra.gmra.mrb[4].mxu0 %vm645_vm2, %v920_v9 }
 0x32d   : > { %2019 = vmatmul.mubr.msk.f32.vlgmr.msra.gmra.mrb[6].mxu1 %vm645_vm2, %v844_v8  ;;  %2038 = vmatprep.mubr.msk.f32.mxu0 %vm2181_vm0, %v2182_v11 }
 0x32e   : > { %2023 = vmatprep.mubr.msk.f32.mxu1 %vm2181_vm0, %v2182_v11 }
 0x32f   : > { %v922_v10 = vpop.permute.xlu1 %921 }
 0x330   : > { %2022 = vmatpush3.xpose.msk.msra.mxu1 %vm645_vm2, %v922_v10 }
 0x331   : > { %2031 = vmatprep.subr.mxu1 %v2182_v11 }
 0x333   : > { %2024 = vmatmul.mubr.msk.f32.vlgmr.msra.gmra.mrb[8].mxu1 %vm645_vm2, %v920_v9 }
 0x334   : > { %2033 = vmatprep.mubr.msk.f32.mxu1 %vm2181_vm0, %v2182_v11 }
 0x3ff   : > { %v1075_v12 = vpop.f32.mrb[4].mxu0 }
 0x400   : > { %1080 = vrot.lane.b32.xlu1 %v1075_v12, %s2183_s11  ;;  %v914_v13 = vpop.f32.mrb[6].mxu1  ;;  %v2030_v14 = vpop.f32.mrb[5].mxu0 }
 0x401   : > { %918 = vst.msk [vmem:[#allocation2] sm:$0xff] %vm645_vm2, %v914_v13  ;;  %v2020_v15 = vpop.f32.mrb[7].mxu1 }
 0x404   : > { %1083 = vrot.lane.b32.xlu1 %v1075_v12, %s2184_s12 }
 0x406   : > { %v993_v16 = vpop.f32.mrb[8].mxu1 }
 0x407   : > { %v997_v17 = vsel %vm635_vm3, %v993_v16, -1e+20  ;;  %v2025_v19 = vpop.f32.mrb[9].mxu1 }
 0x408   : > { %v998_v20 = vsel %vm645_vm2, %v997_v17, -inf }
 0x409   : > { %999 = vmax.xlane.f32.xlu0 %v998_v20 }
 0x472   : > { %v1081_v22 = vpop.permute.xlu1 %1080 }
 0x476   : > { %v1084_v24 = vpop.permute.xlu1 %1083 }
 0x477   : > { %v1086_v27 = vsel %vm814_vm4, %v1081_v22, %v1084_v24 }
 0x478   : > { %v1087_v28 = vsel %vm2382_vm5, %v1086_v27, %v1075_v12 }
 0x479   : > { %1089 = vrot.lane.b32.xlu1 %v1087_v28, %s2186_s23  ;;  %1092 = vrot.lane.b32.xlu0 %v1087_v28, %s2185_s22 }
 0x47d   : > { %1109 = vrot.lane.b32.xlu0 %v2395_v53, %s2189_s28 }
 0x496   : > { %v1000_v29 = vpop.xlane.xlu0 %999 }
 0x497   : > { %v1001_v30 = vsub.f32 %v997_v17, %v1000_v29 }
 0x499   : > { %v1002_v31 = vmul.f32 1.442695, %v1001_v30 }
 0x49b   : > { %2144 = vpow2.f32 %v1002_v31 }
 0x4a5   : > { %v2145_v32 = vpop.eup %2144 }
 0x4a6   : > { %v1004_v33 = vsel %vm645_vm2, %v2145_v32, 0.0 }
 0x4a7   : > { %1005 = vadd.xlane.f32.xlu1 %v1004_v33 }
 0x4eb   : > { %v1090_v34 = vpop.permute.xlu1 %1089  ;;  %v1093_v35 = vpop.permute.xlu0 %1092 }
 0x4ec   : > { %v1095_v36 = vsel %vm826_vm6, %v1090_v34, %v1093_v35 }
 0x4ed   : > { %v1096_v37 = vsel %vm2399_vm7, %v1095_v36, %v1087_v28 }
 0x4ee   : > { %1098 = vrot.lane.b32.xlu0 %v1096_v37, %s2187_s26 }
 0x4ef   : > { %v1110_v38 = vpop.permute.xlu0 %1109 }
 0x4f0   : > { %2032 = vmatpush3.msra.mxu1 %v1110_v38 }
 0x4f1   : > { %2041 = vmatprep.subr.mxu1 %v2182_v11 }
 0x4f2   : > { %1101 = vrot.lane.b32.xlu0 %v1096_v37, %s2188_s27 }
 0x4f6   : > { %1191 = vrot.lane.b32.xlu0 %v2328_v21, %s2190_s29 }
 0x4fa   : > { %1193 = vrot.lane.b32.xlu0 %v2326_v18, %s2190_s29 }
 0x534   : > { %v1006_v39 = vpop.xlane.xlu1 %1005 }
 0x535   : > { %2146 = vrcp.f32 %v1006_v39 }
 0x53f   : > { %v2147_v41 = vpop.eup %2146 }
 0x540   : > { %v1008_v45 = vmul.f32 %v2147_v41, %v2145_v32 }
 0x560   : > { %v1099_v40 = vpop.permute.xlu0 %1098 }
 0x564   : > { %v1102_v43 = vpop.permute.xlu0 %1101 }
 0x565   : > { %v1104_v44 = vsel %vm838_vm8, %v1099_v40, %v1102_v43 }
 0x566   : > { %v1105_v46 = vsel %vm2412_vm9, %v1104_v44, %v1096_v37 }
 0x567   : > { %v1106_v47 = vsel %vm636_vm10, %v1105_v46, 0.0 }
 0x568   : > { %v1107_v48 = vadd.f32 %v1106_v47, %v1008_v45  ;;  %v1192_v49 = vpop.permute.xlu0 %1191 }
 0x56a   : > { %2034 = vmatmul.mubr.msk.f32.vlgmr.msra.gmra.mrb[10].mxu1 %vm645_vm2, %v1107_v48 }
 0x56b   : > { %2042 = vmatpush3.xpose.msk.msra.mxu1 %vm645_vm2, %v2336_v23  ;;  %2043 = vmatprep.mubr.msk.f32.mxu1 %vm2181_vm0, %v2182_v11 }
 0x56c   : > { %v1194_v50 = vpop.permute.xlu0 %1193  ;;  %2051 = vmatprep.subr.mxu1 %v2182_v11 }
 0x56d   : > { %2037 = vmatpush3.xpose.msk.msra.mxu0 %vm645_vm2, %v1194_v50 }
 0x56e   : > { %2044 = vmatmul.mubr.msk.f32.vlgmr.msra.gmra.mrb[12].mxu1 %vm645_vm2, %v1192_v49  ;;  %2046 = vmatprep.subr.mxu0 %v2182_v11 }
 0x56f   : > { %2053 = vmatprep.mubr.msk.f32.mxu1 %vm2181_vm0, %v2182_v11 }
 0x570   : > { %2039 = vmatmul.mubr.msk.f32.vlgmr.msra.gmra.mrb[6].mxu0 %vm645_vm2, %v1192_v49 }
 0x571   : > { %2048 = vmatprep.mubr.msk.f32.mxu0 %vm2181_vm0, %v2182_v11 }
 0x63d   : > { %v2480_v51 = vpop.f32.mrb[10].mxu1 }
 0x63e   : > { %v2035_v52 = vpop.f32.mrb[11].mxu1 }
 0x641   : > { %v1347_v54 = vpop.f32.mrb[12].mxu1 }
 0x642   : > { %1355 = vrot.lane.b32.xlu0 %v1347_v54, %s2184_s12  ;;  %1352 = vrot.lane.b32.xlu1 %v1347_v54, %s2183_s11  ;;  %v2045_v55 = vpop.f32.mrb[13].mxu1 }
 0x643   : > { %v1265_v57 = vpop.f32.mrb[6].mxu0 }
 0x644   : > { %v2040_v58 = vpop.f32.mrb[7].mxu0  ;;  %v1269_v59 = vsel %vm635_vm3, %v1265_v57, -1e+20 }
 0x645   : > { %v1270_v60 = vsel %vm645_vm2, %v1269_v59, -inf }
 0x661   : > { %1271 = vmax.xlane.f32.xlu0 %v1270_v60  ;;  %v1737_v60 = vld [vmem:[%s2593_s8 + $0x18] sm:$0xff] }
 0x677   : > { %1380 = vrot.lane.b32.xlu0 %v2395_v53, %s2190_s29 }
 0x6b4   : > { %v1356_v61 = vpop.permute.xlu0 %1355  ;;  %v1353_v62 = vpop.permute.xlu1 %1352 }
 0x6b5   : > { %v1358_v63 = vsel %vm814_vm4, %v1353_v62, %v1356_v61 }
 0x6b6   : > { %v1359_v0 = vsel %vm2382_vm5, %v1358_v63, %v1347_v54 }
 0x6b7   : > { %1361 = vrot.lane.b32.xlu1 %v1359_v0, %s2186_s23 }
 0x6bb   : > { %1364 = vrot.lane.b32.xlu1 %v1359_v0, %s2185_s22 }
 0x6ee   : > { %v1272_v2 = vpop.xlane.xlu0 %1271 }
 0x6ef   : > { %v1273_v4 = vsub.f32 %v1269_v59, %v1272_v2  ;;  %v1736_v59 = vld [vmem:[%s2593_s8 + $0x10] sm:$0xff] }
 0x6f0   : > { %v2099_v61 = vpack.c.bf16 %v1737_v60, %v1736_v59 }
 0x6f1   : > { %v1274_v5 = vmul.f32 1.442695, %v1273_v4  ;;  %v1925_v4 = vld [vmem:[%s2594_s9] ss:$0 sm:$0xff] }
 0x6f2   : > { %v1381_v6 = vpop.permute.xlu0 %1380 }
 0x6f3   : > { %2148 = vpow2.f32 %v1274_v5  ;;  %2047 = vmatpush3.msra.mxu0 %v1381_v6 }
 0x6f4   : > { %2056 = vmatprep.subr.mxu0 %v2182_v11 }
 0x6fd   : > { %v2149_v7 = vpop.eup %2148 }
 0x6fe   : > { %v1276_v8 = vsel %vm645_vm2, %v2149_v7, 0.0 }
 0x6ff   : > { %1277 = vadd.xlane.f32.xlu1 %v1276_v8 }
 0x729   : > { %v1362_v9 = vpop.permute.xlu1 %1361 }
 0x72d   : > { %v1365_v10 = vpop.permute.xlu1 %1364 }
 0x72e   : > { %v1367_v12 = vsel %vm826_vm6, %v1362_v9, %v1365_v10 }
 0x72f   : > { %v1368_v13 = vsel %vm2399_vm7, %v1367_v12, %v1359_v0 }
 0x730   : > { %1373 = vrot.lane.b32.xlu1 %v1368_v13, %s2188_s27  ;;  %1370 = vrot.lane.b32.xlu0 %v1368_v13, %s2187_s26 }
 0x734   : > { %1462 = vrot.lane.b32.xlu0 %v2328_v21, %s2191_s30 }
 0x738   : > { %1464 = vrot.lane.b32.xlu0 %v2326_v18, %s2191_s30 }
 0x78c   : > { %v1278_v14 = vpop.xlane.xlu1 %1277 }
 0x78d   : > { %2150 = vrcp.f32 %v1278_v14 }
 0x797   : > { %v2151_v15 = vpop.eup %2150 }
 0x798   : > { %v1280_v20 = vmul.f32 %v2151_v15, %v2149_v7 }
 0x7a2   : > { %v1371_v16 = vpop.permute.xlu0 %1370  ;;  %v1374_v17 = vpop.permute.xlu1 %1373 }
 0x7a3   : > { %v1376_v19 = vsel %vm838_vm8, %v1371_v16, %v1374_v17 }
 0x7a4   : > { %v1377_v22 = vsel %vm2412_vm9, %v1376_v19, %v1368_v13 }
 0x7a5   : > { %v1378_v24 = vsel %vm636_vm10, %v1377_v22, 0.0 }
 0x7a6   : > { %v1379_v27 = vadd.f32 %v1378_v24, %v1280_v20  ;;  %v1463_v21 = vpop.permute.xlu0 %1462 }
 0x7a8   : > { %2049 = vmatmul.mubr.msk.f32.vlgmr.msra.gmra.mrb[8].mxu0 %vm645_vm2, %v1379_v27 }
 0x7a9   : > { %2057 = vmatpush3.xpose.msk.msra.mxu0 %vm645_vm2, %v2336_v23  ;;  %2058 = vmatprep.mubr.msk.f32.mxu0 %vm2181_vm0, %v2182_v11 }
 0x7aa   : > { %v1465_v18 = vpop.permute.xlu0 %1464  ;;  %2095 = vmatprep.subr.bf16.mxu0 %v2180_v3 }
 0x7ab   : > { %2052 = vmatpush3.xpose.msk.msra.mxu1 %vm645_vm2, %v1465_v18 }
 0x7ac   : > { %2059 = vmatmul.mubr.msk.f32.vlgmr.msra.gmra.mrb[10].mxu0 %vm645_vm2, %v1463_v21  ;;  %2061 = vmatprep.subr.mxu1 %v2182_v11 }
 0x7ad   : > { %2074 = vmatprep.mubr.msk.f32.mxu0 %vm2181_vm0, %v2182_v11  ;;  %2097 = vmatpush3.bf16.msra.mxu0 %v2096_v26 }
 0x7ae   : > { %2054 = vmatmul.mubr.msk.f32.vlgmr.msra.gmra.mrb[14].mxu1 %vm645_vm2, %v1463_v21  ;;  %2098 = vmatprep.subr.bf16.mxu0 %v2180_v3 }
 0x7af   : > { %2063 = vmatprep.mubr.msk.f32.mxu1 %vm2181_vm0, %v2182_v11 }
 0x7b1   : > { %2100 = vmatpush3.bf16.msra.mxu0 %v2099_v61 }
 0x87b   : > { %v1452_v23 = vpop.f32.mrb[8].mxu0 }
 0x87c   : > { %v2050_v28 = vpop.f32.mrb[9].mxu0 }
 0x87f   : > { %v1618_v29 = vpop.f32.mrb[10].mxu0 }
 0x880   : > { %1623 = vrot.lane.b32.xlu0 %v1618_v29, %s2183_s11  ;;  %v2060_v30 = vpop.f32.mrb[11].mxu0  ;;  %s2192_s11 = smov 8  }
 0x881   : > { %v1536_v31 = vpop.f32.mrb[14].mxu1 }
 0x882   : > { %v1540_v32 = vsel %vm635_vm3, %v1536_v31, -1e+20  ;;  %v2055_v33 = vpop.f32.mrb[15].mxu1 }
 0x883   : > { %v1541_v34 = vsel %vm645_vm2, %v1540_v32, -inf }
 0x884   : > { %1626 = vrot.lane.b32.xlu0 %v1618_v29, %s2184_s12  ;;  %1542 = vmax.xlane.f32.xlu1 %v1541_v34  ;;  %s2193_s12 = smov 16  }
 0x8f2   : > { %v1624_v35 = vpop.permute.xlu0 %1623 }
 0x8f6   : > { %v1627_v36 = vpop.permute.xlu0 %1626 }
 0x8f7   : > { %v1629_v11 = vsel %vm814_vm4, %v1624_v35, %v1627_v36 }
 0x8f8   : > { %v1630_v37 = vsel %vm2382_vm5, %v1629_v11, %v1618_v29 }
 0x8f9   : > { %1632 = vrot.lane.b32.xlu0 %v1630_v37, %s2186_s23 }
 0x8fd   : > { %1635 = vrot.lane.b32.xlu0 %v1630_v37, %s2185_s22 }
 0x911   : > { %v1543_v38 = vpop.xlane.xlu1 %1542 }
 0x912   : > { %v1544_v39 = vsub.f32 %v1540_v32, %v1543_v38 }
 0x914   : > { %v1545_v40 = vmul.f32 1.442695, %v1544_v39 }
 0x916   : > { %2152 = vpow2.f32 %v1545_v40 }
 0x920   : > { %v2153_v41 = vpop.eup %2152 }
 0x921   : > { %v1547_v43 = vsel %vm645_vm2, %v2153_v41, 0.0 }
 0x922   : > { %1548 = vadd.xlane.f32.xlu0 %v1547_v43 }
 0x96b   : > { %v1633_v44 = vpop.permute.xlu0 %1632 }
 0x96f   : > { %v1636_v45 = vpop.permute.xlu0 %1635 }
 0x970   : > { %v1638_v46 = vsel %vm826_vm6, %v1633_v44, %v1636_v45 }
 0x971   : > { %v1639_v42 = vsel %vm2399_vm7, %v1638_v46, %v1630_v37 }
 0x972   : > { %1641 = vrot.lane.b32.xlu1 %v1639_v42, %s2187_s26  ;;  %1644 = vrot.lane.b32.xlu0 %v1639_v42, %s2188_s27  ;;  %s2194_s26 = smov 24  }
 0x976   : > { %1651 = vrot.lane.b32.xlu1 %v2395_v53, %s2191_s30 }
 0x97a   : > { %1186 = vrot.lane.b32.xlu1 %v2480_v51, %s2192_s11  ;;  %s374_s11 = scalar_lea.vmem %s2595_s10, %s1897_s17 }
 0x97e   : > { %1457 = vrot.lane.b32.xlu1 %v1452_v23, %s2193_s12 }
 0x9af   : > { %v1549_v47 = vpop.xlane.xlu0 %1548 }
 0x9b0   : > { %2154 = vrcp.f32 %v1549_v47 }
 0x9ba   : > { %v2155_v48 = vpop.eup %2154 }
 0x9bb   : > { %v1551_v52 = vmul.f32 %v2155_v48, %v2153_v41 }
 0x9e4   : > { %v1645_v49 = vpop.permute.xlu0 %1644  ;;  %v1642_v50 = vpop.permute.xlu1 %1641 }
 0x9e5   : > { %v1647_v56 = vsel %vm838_vm8, %v1642_v50, %v1645_v49 }
 0x9e6   : > { %v1648_v54 = vsel %vm2412_vm9, %v1647_v56, %v1639_v42 }
 0x9e7   : > { %v1649_v53 = vsel %vm636_vm10, %v1648_v54, 0.0 }
 0x9e8   : > { %v1650_v55 = vadd.f32 %v1649_v53, %v1551_v52  ;;  %v1652_v57 = vpop.permute.xlu1 %1651 }
 0x9e9   : > { %2062 = vmatpush3.msra.mxu1 %v1652_v57 }
 0x9ea   : > { %2064 = vmatmul.mubr.msk.f32.vlgmr.msra.gmra.mrb[16].mxu1 %vm645_vm2, %v1650_v55 }
 0x9ec   : > { %v1187_v51 = vpop.permute.xlu1 %1186 }
 0x9ed   : > { %1190 = vst.msk [vmem:[#allocation2] sm:$0xff] %vm1189_vm11, %v1187_v51 }
 0x9f0   : > { %v1458_v58 = vpop.permute.xlu1 %1457 }
 0x9f1   : > { %1461 = vst.msk [vmem:[#allocation2] sm:$0xff] %vm1460_vm12, %v1458_v58 }
 0xabd   : > { %v1723_v62 = vpop.f32.mrb[16].mxu1 }
 0xabe   : > { %1728 = vrot.lane.b32.xlu0 %v1723_v62, %s2194_s26  ;;  %v2065_v63 = vpop.f32.mrb[17].mxu1 }
 0xb30   : > { %v1729_v0 = vpop.permute.xlu0 %1728 }
 0xb31   : > { %1732 = vst.msk [vmem:[#allocation2] sm:$0xff] %vm1731_vm13, %v1729_v0 }
 0xb38   : > { %v1733_v2 = vld [vmem:[#allocation2] sm:$0xff] }
 0xb39   : > { %2075 = vmatmul.mubr.msk.f32.vlgmr.msra.gmra.mrb[12].mxu0 %vm390_vm1, %v1733_v2 }
 0xc0c   : > { %v1814_v3 = vpop.f32.mrb[12].mxu0 }
 0xc0d   : > { %v1815_v5 = vadd.f32 %v1925_v4, %v1814_v3  ;;  %v2076_v6 = vpop.f32.mrb[13].mxu0 }
 0xc0f   : > { %1818 = vst.msk [vmem:[%s374_s11] sm:$0xff] %vm390_vm1, %v1815_v5 }
 0xc10 PF: > { %s20_s15 = sadd.s32 1, %s2178_s15   ;;  %s2602_s13 = smov %s2174_s14 }
 0xc11   : > { %p17_p5 = scmp.ge.s32.totalorder %s20_s15, 4   ;;  %s2603_s14 = smov %s2605_s16 }
 0xc13   :  { %19 = sbr.rel (!%p17_p5) target bundleno = 2 (0x2), region = 91 }

</bundles_post_ra>
